<compile_context>
chip_gen: v7x
topology: tpu7x:2x2x1
jax: 0.10.0
libtpu: 0.0.40
codegen_flags: <defaults>
</compile_context>

<pallas_src>
import math
from functools import partial

import jax
import jax.numpy as jnp
from jax.experimental import pallas as pl
from jax.experimental.pallas import tpu as pltpu

MODALITIES = ('text', 'audio', 'image')


# --------------------------------------------------------------------------------------
# In-kernel helpers
# --------------------------------------------------------------------------------------
def _layer_norm(y, g, b, eps=1e-5):
    mu = jnp.mean(y, axis=-1, keepdims=True)
    var = jnp.mean(jnp.square(y - mu), axis=-1, keepdims=True)
    return (y - mu) * jax.lax.rsqrt(var + eps) * g + b


def _mm(a, w):
    """bf16 MXU matmul with f32 accumulation (weights are pre-cast to bf16)."""
    return jnp.dot(a.astype(jnp.bfloat16), w, preferred_element_type=jnp.float32)


# --------------------------------------------------------------------------------------
# The fused CMAN kernel (grid over fusion layers)
# --------------------------------------------------------------------------------------
def _cman_kernel(feat_ref, mask_ref, win_ref, bin_ref,
                 wqkv_ref, bqkv_ref, wo_ref, bo_ref,
                 g1_ref, be1_ref, w1_ref, bf1_ref,
                 w2_ref, bf2_ref, g2_ref, be2_ref,
                 wout_ref, bout_ref,
                 o_ref, x_ref, *, num_heads, num_modalities):
    B = feat_ref.shape[0]
    D = wqkv_ref.shape[0]           # embed dim (layer refs have the L axis squeezed)
    S = num_modalities
    H = num_heads
    dh = D // H
    SB = S * B                      # number of token rows in the residual stream
    layer = pl.program_id(0)

    # ---- grid step 0: fused block-diagonal modality input projection --------------------
    @pl.when(layer == 0)
    def _():
        proj = _mm(feat_ref[...], win_ref[...]) + bin_ref[...]          # (B, S*D)
        # modality-major token rows: row = m*B + b  (lane slices only, no lane-split reshape)
        x_ref[...] = jnp.concatenate(
            [proj[:, m * D:(m + 1) * D] for m in range(S)], axis=0)

    xf = x_ref[...]                                                      # (S*B, D) f32

    # ---- fused QKV: one MXU matmul (1/sqrt(dh) already folded into the Q columns) -------
    qkv = _mm(xf, wqkv_ref[...]) + bqkv_ref[...]                         # (S*B, 3D)
    q = qkv[:, :D]
    k = qkv[:, D:2 * D]
    v = qkv[:, 2 * D:]

    # ---- merge head + batch onto the row axis: row = h*S*B + (m*B + b) ------------------
    # TODO(synk): swap the slice+concat head split for reshape(B,S,H,dh)+pltpu.einshape once
    # pl.lower_as_mlir confirms the lane-splitting reshape lowers to a single transpose.
    qh = jnp.concatenate([q[:, h * dh:(h + 1) * dh] for h in range(H)], axis=0)
    kh = jnp.concatenate([k[:, h * dh:(h + 1) * dh] for h in range(H)], axis=0)
    vh = jnp.concatenate([v[:, h * dh:(h + 1) * dh] for h in range(H)], axis=0)

    # ---- attention: two plain 2-D MXU dots; cross-batch/head pairs masked additively ----
    s_ = jax.lax.dot_general(qh.astype(jnp.bfloat16), kh.astype(jnp.bfloat16),
                             (((1,), (1,)), ((), ())),
                             preferred_element_type=jnp.float32)         # (H*S*B, H*S*B)
    s_ = s_ + mask_ref[...]           # additive -1e30 mask MUST stay f32 (bf16 would -inf)
    m_ = jnp.max(s_, axis=-1, keepdims=True)
    e_ = jnp.exp(s_ - m_)
    p_ = e_ * pl.reciprocal(jnp.sum(e_, axis=-1, keepdims=True), approx=True)
    ctx = jnp.dot(p_.astype(jnp.bfloat16), vh.astype(jnp.bfloat16),
                  preferred_element_type=jnp.float32)                    # (H*S*B, dh)
    # re-concatenate heads along lanes in PyTorch order (head h -> dims h*dh:(h+1)*dh)
    ctx = jnp.concatenate([ctx[h * SB:(h + 1) * SB, :] for h in range(H)], axis=-1)

    attn = _mm(ctx, wo_ref[...]) + bo_ref[...]
    x1 = _layer_norm(xf + attn, g1_ref[...], be1_ref[...])

    # FFN (dropout = identity at inference)
    # TODO(synk): PyTorch nn.GELU() is the exact erf form; tanh approximation used here.
    h1 = jax.nn.gelu(_mm(x1, w1_ref[...]) + bf1_ref[...], approximate=True)
    ffn = _mm(h1, w2_ref[...]) + bf2_ref[...]
    x2 = _layer_norm(x1 + ffn, g2_ref[...], be2_ref[...])
    x_ref[...] = x2

    # ---- last grid step: fused output projection + L2 norm, lane-dense 128-wide store ---
    @pl.when(layer == pl.num_programs(0) - 1)
    def _():
        xc = jnp.concatenate([x2[m * B:(m + 1) * B, :] for m in range(S)], axis=-1)  # (B, S*D)
        y = _mm(xc, wout_ref[...]) + bout_ref[...]                                   # (B, S*D)
        segs = []
        for m in range(S):
            ym = y[:, m * D:(m + 1) * D]
            ss = jnp.sum(ym * ym, axis=-1, keepdims=True)
            # ym * rsqrt(max(ss, eps^2)) == ym / max(||ym||, 1e-12)   (torch F.normalize)
            segs.append(ym * jax.lax.rsqrt(jnp.maximum(ss, 1e-24)))
        pad = o_ref.shape[1] - S * D
        if pad:
            segs.append(jnp.zeros((B, pad), jnp.float32))
        o_ref[...] = jnp.concatenate(segs, axis=-1)    # one unmasked lane-dense store


# --------------------------------------------------------------------------------------
# Forward wrapper: one pallas_call, grid over fusion layers
# --------------------------------------------------------------------------------------
@partial(jax.jit, static_argnames=('num_heads',))
def cman_forward(packed, text_feat, audio_feat, image_feat, *, num_heads):
    B = text_feat.shape[0]
    S = len(MODALITIES)
    L, D = packed['wqkv'].shape[0], packed['wqkv'].shape[1]
    SD = S * D
    OUT_PAD = ((SD + 127) // 128) * 128

    feat = jnp.concatenate([text_feat, audio_feat, image_feat], axis=-1)   # (B, Tt+Ta+Ti)

    # Block-diagonal additive mask over the merged (head, modality, batch) row axis:
    # row i = h*S*B + m*B + b; rows attend iff same head AND same batch (constant-folded).
    N = num_heads * S * B
    idx = jnp.arange(N)
    same = ((idx[:, None] // (S * B)) == (idx[None, :] // (S * B))) & \
           ((idx[:, None] % B) == (idx[None, :] % B))
    mask = jnp.where(same, 0.0, -1e30).astype(jnp.float32)

    def _full_spec(a):
        nd = a.ndim
        return pl.BlockSpec(a.shape, lambda l: (0,) * nd)

    def _layer_spec(a):
        nd = a.ndim
        return pl.BlockSpec((None,) + a.shape[1:], lambda l: (l,) + (0,) * (nd - 1))

    layer_keys = ('wqkv', 'bqkv', 'wo', 'bo', 'g1', 'be1',
                  'w1', 'bf1', 'w2', 'bf2', 'g2', 'be2')
    args = (feat, mask, packed['win'], packed['bin'],
            *[packed[k] for k in layer_keys],
            packed['wout'], packed['bout'])
    in_specs = ([_full_spec(feat), _full_spec(mask),
                 _full_spec(packed['win']), _full_spec(packed['bin'])]
                + [_layer_spec(packed[k]) for k in layer_keys]
                + [_full_spec(packed['wout']), _full_spec(packed['bout'])])

    # TODO(synk): for large batches (B >= a few hundred token rows per core) add a leading
    # batch grid axis with dimension_semantics=("parallel", "arbitrary") to engage the
    # second v7x TensorCore; at B=4 the per-step grid overhead would dominate.
    out = pl.pallas_call(
        partial(_cman_kernel, num_heads=num_heads, num_modalities=S),
        out_shape=jax.ShapeDtypeStruct((B, OUT_PAD), jnp.float32),
        grid_spec=pltpu.PrefetchScalarGridSpec(
            num_scalar_prefetch=0,
            grid=(L,),                                   # layer streaming: ~2 layers resident
            in_specs=in_specs,
            out_specs=pl.BlockSpec((B, OUT_PAD), lambda l: (0, 0)),
            scratch_shapes=[pltpu.VMEM((S * B, D), jnp.float32)]),   # persistent residual
        compiler_params=pltpu.CompilerParams(dimension_semantics=("arbitrary",)),
    )(*args)

    out = out[:, :SD]
    return {f'{mod}_embeddings': out[:, m * D:(m + 1) * D]
            for m, mod in enumerate(MODALITIES)}


# --------------------------------------------------------------------------------------
# Deterministic synthetic parameters (canonical f32) + packing into kernel layout
# --------------------------------------------------------------------------------------
def init_params(key, text_dim, audio_dim, image_dim, embed_dim, ff_dim, num_layers):
    keys = iter(jax.random.split(key, 256))

    def w(din, dout):
        return jax.random.normal(next(keys), (din, dout), jnp.float32) * 0.02

    def b(dout, as_2d=False):
        v = jax.random.normal(next(keys), (dout,), jnp.float32) * 0.02
        return v.reshape(1, dout) if as_2d else v

    params = {
        'text_proj':  (w(text_dim,  embed_dim), b(embed_dim)),
        'audio_proj': (w(audio_dim, embed_dim), b(embed_dim)),
        'image_proj': (w(image_dim, embed_dim), b(embed_dim)),
        'temperature': jnp.float32(0.07),   # loss-only parameter; unused in this path
        'fusion_layers': [],
        'out_proj': {},
    }
    for _ in range(num_layers):
        params['fusion_layers'].append({
            'wq': w(embed_dim, embed_dim), 'wk': w(embed_dim, embed_dim),
            'wv': w(embed_dim, embed_dim),
            'bq': b(embed_dim, True), 'bk': b(embed_dim, True), 'bv': b(embed_dim, True),
            'wo': w(embed_dim, embed_dim), 'bo': b(embed_dim, True),
            'ln1_g': jnp.ones((1, embed_dim), jnp.float32),
            'ln1_b': jnp.zeros((1, embed_dim), jnp.float32),
            'ffn_w1': w(embed_dim, ff_dim), 'ffn_b1': b(ff_dim, True),
            'ffn_w2': w(ff_dim, embed_dim), 'ffn_b2': b(embed_dim, True),
            'ln2_g': jnp.ones((1, embed_dim), jnp.float32),
            'ln2_b': jnp.zeros((1, embed_dim), jnp.float32),
        })
    for mod in MODALITIES:
        params['out_proj'][mod] = (w(embed_dim, embed_dim), b(embed_dim))
    return params


def pack_params(params, num_heads):
    layers = params['fusion_layers']
    S = len(MODALITIES)
    D = params['text_proj'][0].shape[1]
    dh = D // num_heads
    scale = 1.0 / math.sqrt(dh)

    def stk(key, dtype=jnp.float32):
        return jnp.stack([lp[key] for lp in layers]).astype(dtype)

    # fused block-diagonal input projection: [text|audio|image] lanes -> [t|a|i] D-lane slots
    wt, bt = params['text_proj']
    wa, ba = params['audio_proj']
    wi, bi = params['image_proj']
    fin = wt.shape[0] + wa.shape[0] + wi.shape[0]
    win = jnp.zeros((fin, S * D), jnp.float32)
    off = 0
    for m, wm in enumerate((wt, wa, wi)):
        win = win.at[off:off + wm.shape[0], m * D:(m + 1) * D].set(wm)
        off += wm.shape[0]
    bin_ = jnp.concatenate([bt, ba, bi]).reshape(1, S * D)

    # fused QKV with 1/sqrt(dh) folded into the Q columns (weight AND bias)
    wqkv = jnp.stack([jnp.concatenate([lp['wq'] * scale, lp['wk'], lp['wv']], axis=1)
                      for lp in layers]).astype(jnp.bfloat16)
    bqkv = jnp.stack([jnp.concatenate([lp['bq'] * scale, lp['bk'], lp['bv']], axis=1)
                      for lp in layers]).astype(jnp.float32)

    # fused block-diagonal output projection
    wout = jnp.zeros((S * D, S * D), jnp.float32)
    bouts = []
    for m, mod in enumerate(MODALITIES):
        wm, bm = params['out_proj'][mod]
        wout = wout.at[m * D:(m + 1) * D, m * D:(m + 1) * D].set(wm)
        bouts.append(bm)
    bout = jnp.concatenate(bouts).reshape(1, S * D)

    return dict(
        win=win.astype(jnp.bfloat16), bin=bin_,
        wqkv=wqkv, bqkv=bqkv,
        wo=stk('wo', jnp.bfloat16), bo=stk('bo'),
        g1=stk('ln1_g'), be1=stk('ln1_b'),
        w1=stk('ffn_w1', jnp.bfloat16), bf1=stk('ffn_b1'),
        w2=stk('ffn_w2', jnp.bfloat16), bf2=stk('ffn_b2'),
        g2=stk('ln2_g'), be2=stk('ln2_b'),
        wout=wout.astype(jnp.bfloat16), bout=bout,
    )


# --------------------------------------------------------------------------------------
if __name__ == "__main__":
    B = 4
    TEXT_DIM, AUDIO_DIM, IMAGE_DIM = 48, 40, 56
    EMBED_DIM, NUM_HEADS, FF_DIM, NUM_LAYERS = 32, 4, 64, 2

    key = jax.random.PRNGKey(0)
    k_param, k_t, k_a, k_i = jax.random.split(key, 4)
    params = init_params(k_param, TEXT_DIM, AUDIO_DIM, IMAGE_DIM,
                         EMBED_DIM, FF_DIM, NUM_LAYERS)
    packed = pack_params(params, NUM_HEADS)

    # TODO(synk): text/audio/image encoders are opaque external modules in the reference;
    # the kernel consumes their (batch, output_dim) encoded features directly.
    text_feat = jax.random.normal(k_t, (B, TEXT_DIM), jnp.float32)
    audio_feat = jax.random.normal(k_a, (B, AUDIO_DIM), jnp.float32)
    image_feat = jax.random.normal(k_i, (B, IMAGE_DIM), jnp.float32)

    outs = cman_forward(packed, text_feat, audio_feat, image_feat, num_heads=NUM_HEADS)
    jax.block_until_ready(outs)

    for mod in MODALITIES:
        emb = outs[f'{mod}_embeddings']
        assert emb.shape == (B, EMBED_DIM)
        assert bool(jnp.all(jnp.isfinite(emb)))
        # normalized embeddings must have unit L2 norm
        assert bool(jnp.allclose(jnp.linalg.norm(emb, axis=-1), 1.0, atol=1e-4))

    print("KERNEL_OK")
</pallas_src>

<mosaic_0001>
module attributes {stable_mosaic.version = 11 : i64} {
  func.func @_cman_kernel(%arg0: i32, %arg1: memref<4x144xf32, #tpu.memory_space<vmem>>, %arg2: memref<48x48xf32, #tpu.memory_space<vmem>>, %arg3: memref<144x96xbf16, #tpu.memory_space<vmem>>, %arg4: memref<1x96xf32, #tpu.memory_space<vmem>>, %arg5: memref<1x32x96xbf16, #tpu.memory_space<vmem>>, %arg6: memref<1x1x96xf32, #tpu.memory_space<vmem>>, %arg7: memref<1x32x32xbf16, #tpu.memory_space<vmem>>, %arg8: memref<1x1x32xf32, #tpu.memory_space<vmem>>, %arg9: memref<1x1x32xf32, #tpu.memory_space<vmem>>, %arg10: memref<1x1x32xf32, #tpu.memory_space<vmem>>, %arg11: memref<1x32x64xbf16, #tpu.memory_space<vmem>>, %arg12: memref<1x1x64xf32, #tpu.memory_space<vmem>>, %arg13: memref<1x64x32xbf16, #tpu.memory_space<vmem>>, %arg14: memref<1x1x32xf32, #tpu.memory_space<vmem>>, %arg15: memref<1x1x32xf32, #tpu.memory_space<vmem>>, %arg16: memref<1x1x32xf32, #tpu.memory_space<vmem>>, %arg17: memref<96x96xbf16, #tpu.memory_space<vmem>>, %arg18: memref<1x96xf32, #tpu.memory_space<vmem>>, %arg19: memref<4x128xf32, #tpu.memory_space<vmem>>, %arg20: memref<12x32xf32, #tpu.memory_space<vmem>>) attributes {dimension_semantics = [#tpu.dimension_semantics<arbitrary>], iteration_bounds = array<i64: 2>, scalar_prefetch = 0 : i64, scratch_operands = 1 : i64, tpu.core_type = #tpu.core_type<tc>, window_params = [{pipeline_mode = #tpu.pipeline_mode<synchronous>, transform_indices = @transform_0, window_bounds = array<i64: 4, 144>}, {pipeline_mode = #tpu.pipeline_mode<synchronous>, transform_indices = @transform_1, window_bounds = array<i64: 48, 48>}, {pipeline_mode = #tpu.pipeline_mode<synchronous>, transform_indices = @transform_2, window_bounds = array<i64: 144, 96>}, {pipeline_mode = #tpu.pipeline_mode<synchronous>, transform_indices = @transform_3, window_bounds = array<i64: 1, 96>}, {transform_indices = @transform_4, window_bounds = array<i64: 1, 32, 96>}, {transform_indices = @transform_5, window_bounds = array<i64: 1, 1, 96>}, {transform_indices = @transform_6, window_bounds = array<i64: 1, 32, 32>}, {transform_indices = @transform_7, window_bounds = array<i64: 1, 1, 32>}, {transform_indices = @transform_8, window_bounds = array<i64: 1, 1, 32>}, {transform_indices = @transform_9, window_bounds = array<i64: 1, 1, 32>}, {transform_indices = @transform_10, window_bounds = array<i64: 1, 32, 64>}, {transform_indices = @transform_11, window_bounds = array<i64: 1, 1, 64>}, {transform_indices = @transform_12, window_bounds = array<i64: 1, 64, 32>}, {transform_indices = @transform_13, window_bounds = array<i64: 1, 1, 32>}, {transform_indices = @transform_14, window_bounds = array<i64: 1, 1, 32>}, {transform_indices = @transform_15, window_bounds = array<i64: 1, 1, 32>}, {pipeline_mode = #tpu.pipeline_mode<synchronous>, transform_indices = @transform_16, window_bounds = array<i64: 96, 96>}, {pipeline_mode = #tpu.pipeline_mode<synchronous>, transform_indices = @transform_17, window_bounds = array<i64: 1, 96>}, {pipeline_mode = #tpu.pipeline_mode<synchronous>, transform_indices = @transform_18, window_bounds = array<i64: 4, 128>}]} {
    %c0_i32 = arith.constant 0 : i32
    %0 = arith.cmpi eq, %arg0, %c0_i32 : i32
    %1 = arith.extui %0 : i1 to i32
    %c0_i32_0 = arith.constant 0 : i32
    %2 = arith.cmpi ne, %1, %c0_i32_0 : i32
    scf.if %2 {
      %c0_64 = arith.constant 0 : index
      %c0_65 = arith.constant 0 : index
      %148 = vector.load %arg1[%c0_64, %c0_65] : memref<4x144xf32, #tpu.memory_space<vmem>>, vector<4x144xf32>
      %c0_66 = arith.constant 0 : index
      %c0_67 = arith.constant 0 : index
      %149 = vector.load %arg3[%c0_66, %c0_67] : memref<144x96xbf16, #tpu.memory_space<vmem>>, vector<144x96xbf16>
      %150 = arith.truncf %148 : vector<4x144xf32> to vector<4x144xbf16>
      %cst_68 = arith.constant dense<0.000000e+00> : vector<4x96xf32>
      %151 = tpu.matmul %150, %149, %cst_68 {dimension_numbers = #tpu.dot_dimension_numbers<[1], [0], [0], [1], [0, 0, 1, 1], [], []>} : vector<4x144xbf16>, vector<144x96xbf16>, vector<4x96xf32> -> vector<4x96xf32>
      %c0_69 = arith.constant 0 : index
      %c0_70 = arith.constant 0 : index
      %152 = vector.load %arg4[%c0_69, %c0_70] : memref<1x96xf32, #tpu.memory_space<vmem>>, vector<1x96xf32>
      %153 = vector.broadcast %152 : vector<1x96xf32> to vector<4x96xf32>
      %154 = arith.addf %151, %153 : vector<4x96xf32>
      %155 = vector.extract_strided_slice %154 {offsets = [0, 0], sizes = [4, 32], strides = [1, 1]} : vector<4x96xf32> to vector<4x32xf32>
      %156 = vector.extract_strided_slice %154 {offsets = [0, 32], sizes = [4, 32], strides = [1, 1]} : vector<4x96xf32> to vector<4x32xf32>
      %157 = vector.extract_strided_slice %154 {offsets = [0, 64], sizes = [4, 32], strides = [1, 1]} : vector<4x96xf32> to vector<4x32xf32>
      %158 = tpu.concatenate %155, %156, %157 in 0 : vector<4x32xf32>, vector<4x32xf32>, vector<4x32xf32> -> vector<12x32xf32>
      %c0_71 = arith.constant 0 : index
      %c0_72 = arith.constant 0 : index
      %159 = vector.load %arg20[%c0_71, %c0_72] : memref<12x32xf32, #tpu.memory_space<vmem>>, vector<12x32xf32>
      tpu.vector_store %arg20[%c0_71, %c0_72], %158 {strides = array<i32>} : memref<12x32xf32, #tpu.memory_space<vmem>>, vector<12x32xf32>,
    } else {
    }
    %c0 = arith.constant 0 : index
    %c0_1 = arith.constant 0 : index
    %3 = vector.load %arg20[%c0, %c0_1] : memref<12x32xf32, #tpu.memory_space<vmem>>, vector<12x32xf32>
    %c0_2 = arith.constant 0 : index
    %c0_3 = arith.constant 0 : index
    %c0_4 = arith.constant 0 : index
    %4 = vector.load %arg5[%c0_2, %c0_3, %c0_4] : memref<1x32x96xbf16, #tpu.memory_space<vmem>>, vector<1x32x96xbf16>
    %5 = vector.shape_cast %4 : vector<1x32x96xbf16> to vector<32x96xbf16>
    %6 = arith.truncf %3 : vector<12x32xf32> to vector<12x32xbf16>
    %cst = arith.constant dense<0.000000e+00> : vector<12x96xf32>
    %7 = tpu.matmul %6, %5, %cst {dimension_numbers = #tpu.dot_dimension_numbers<[1], [0], [0], [1], [0, 0, 1, 1], [], []>} : vector<12x32xbf16>, vector<32x96xbf16>, vector<12x96xf32> -> vector<12x96xf32>
    %c0_5 = arith.constant 0 : index
    %c0_6 = arith.constant 0 : index
    %c0_7 = arith.constant 0 : index
    %8 = vector.load %arg6[%c0_5, %c0_6, %c0_7] : memref<1x1x96xf32, #tpu.memory_space<vmem>>, vector<1x1x96xf32>
    %9 = vector.shape_cast %8 : vector<1x1x96xf32> to vector<1x96xf32>
    %10 = vector.broadcast %9 : vector<1x96xf32> to vector<12x96xf32>
    %11 = arith.addf %7, %10 : vector<12x96xf32>
    %12 = vector.extract_strided_slice %11 {offsets = [0, 0], sizes = [12, 32], strides = [1, 1]} : vector<12x96xf32> to vector<12x32xf32>
    %13 = vector.extract_strided_slice %11 {offsets = [0, 32], sizes = [12, 32], strides = [1, 1]} : vector<12x96xf32> to vector<12x32xf32>
    %14 = vector.extract_strided_slice %11 {offsets = [0, 64], sizes = [12, 32], strides = [1, 1]} : vector<12x96xf32> to vector<12x32xf32>
    %15 = vector.extract_strided_slice %12 {offsets = [0, 0], sizes = [12, 8], strides = [1, 1]} : vector<12x32xf32> to vector<12x8xf32>
    %16 = vector.extract_strided_slice %12 {offsets = [0, 8], sizes = [12, 8], strides = [1, 1]} : vector<12x32xf32> to vector<12x8xf32>
    %17 = vector.extract_strided_slice %12 {offsets = [0, 16], sizes = [12, 8], strides = [1, 1]} : vector<12x32xf32> to vector<12x8xf32>
    %18 = vector.extract_strided_slice %12 {offsets = [0, 24], sizes = [12, 8], strides = [1, 1]} : vector<12x32xf32> to vector<12x8xf32>
    %19 = tpu.concatenate %15, %16, %17, %18 in 0 : vector<12x8xf32>, vector<12x8xf32>, vector<12x8xf32>, vector<12x8xf32> -> vector<48x8xf32>
    %20 = vector.extract_strided_slice %13 {offsets = [0, 0], sizes = [12, 8], strides = [1, 1]} : vector<12x32xf32> to vector<12x8xf32>
    %21 = vector.extract_strided_slice %13 {offsets = [0, 8], sizes = [12, 8], strides = [1, 1]} : vector<12x32xf32> to vector<12x8xf32>
    %22 = vector.extract_strided_slice %13 {offsets = [0, 16], sizes = [12, 8], strides = [1, 1]} : vector<12x32xf32> to vector<12x8xf32>
    %23 = vector.extract_strided_slice %13 {offsets = [0, 24], sizes = [12, 8], strides = [1, 1]} : vector<12x32xf32> to vector<12x8xf32>
    %24 = tpu.concatenate %20, %21, %22, %23 in 0 : vector<12x8xf32>, vector<12x8xf32>, vector<12x8xf32>, vector<12x8xf32> -> vector<48x8xf32>
    %25 = vector.extract_strided_slice %14 {offsets = [0, 0], sizes = [12, 8], strides = [1, 1]} : vector<12x32xf32> to vector<12x8xf32>
    %26 = vector.extract_strided_slice %14 {offsets = [0, 8], sizes = [12, 8], strides = [1, 1]} : vector<12x32xf32> to vector<12x8xf32>
    %27 = vector.extract_strided_slice %14 {offsets = [0, 16], sizes = [12, 8], strides = [1, 1]} : vector<12x32xf32> to vector<12x8xf32>
    %28 = vector.extract_strided_slice %14 {offsets = [0, 24], sizes = [12, 8], strides = [1, 1]} : vector<12x32xf32> to vector<12x8xf32>
    %29 = tpu.concatenate %25, %26, %27, %28 in 0 : vector<12x8xf32>, vector<12x8xf32>, vector<12x8xf32>, vector<12x8xf32> -> vector<48x8xf32>
    %30 = arith.truncf %19 : vector<48x8xf32> to vector<48x8xbf16>
    %31 = arith.truncf %24 : vector<48x8xf32> to vector<48x8xbf16>
    %cst_8 = arith.constant dense<0.000000e+00> : vector<48x48xf32>
    %32 = tpu.matmul %30, %31, %cst_8 {dimension_numbers = #tpu.dot_dimension_numbers<[1], [1], [0], [0], [0, 0, 1, 0], [], []>} : vector<48x8xbf16>, vector<48x8xbf16>, vector<48x48xf32> -> vector<48x48xf32>
    %c0_9 = arith.constant 0 : index
    %c0_10 = arith.constant 0 : index
    %33 = vector.load %arg2[%c0_9, %c0_10] : memref<48x48xf32, #tpu.memory_space<vmem>>, vector<48x48xf32>
    %34 = arith.addf %32, %33 : vector<48x48xf32>
    %cst_11 = arith.constant dense<0xFF800000> : vector<48xf32>
    %35 = vector.multi_reduction <maximumf>, %34, %cst_11 [1] : vector<48x48xf32> to vector<48xf32>
    %36 = vector.shape_cast %35 : vector<48xf32> to vector<48x1xf32>
    %37 = vector.broadcast %36 : vector<48x1xf32> to vector<48x48xf32>
    %38 = arith.subf %34, %37 : vector<48x48xf32>
    %39 = math.exp %38 : vector<48x48xf32>
    %cst_12 = arith.constant dense<0.000000e+00> : vector<48xf32>
    %40 = vector.multi_reduction <add>, %39, %cst_12 [1] : vector<48x48xf32> to vector<48xf32>
    %41 = vector.shape_cast %40 : vector<48xf32> to vector<48x1xf32>
    %42 = tpu.reciprocal %41 {approx = true} : vector<48x1xf32> -> vector<48x1xf32>
    %43 = vector.broadcast %42 : vector<48x1xf32> to vector<48x48xf32>
    %44 = arith.mulf %39, %43 : vector<48x48xf32>
    %45 = arith.truncf %44 : vector<48x48xf32> to vector<48x48xbf16>
    %46 = arith.truncf %29 : vector<48x8xf32> to vector<48x8xbf16>
    %cst_13 = arith.constant dense<0.000000e+00> : vector<48x8xf32>
    %47 = tpu.matmul %45, %46, %cst_13 {dimension_numbers = #tpu.dot_dimension_numbers<[1], [0], [0], [1], [0, 0, 1, 1], [], []>} : vector<48x48xbf16>, vector<48x8xbf16>, vector<48x8xf32> -> vector<48x8xf32>
    %48 = vector.extract_strided_slice %47 {offsets = [0, 0], sizes = [12, 8], strides = [1, 1]} : vector<48x8xf32> to vector<12x8xf32>
    %49 = vector.extract_strided_slice %47 {offsets = [12, 0], sizes = [12, 8], strides = [1, 1]} : vector<48x8xf32> to vector<12x8xf32>
    %50 = vector.extract_strided_slice %47 {offsets = [24, 0], sizes = [12, 8], strides = [1, 1]} : vector<48x8xf32> to vector<12x8xf32>
    %51 = vector.extract_strided_slice %47 {offsets = [36, 0], sizes = [12, 8], strides = [1, 1]} : vector<48x8xf32> to vector<12x8xf32>
    %52 = tpu.concatenate %48, %49, %50, %51 in 1 : vector<12x8xf32>, vector<12x8xf32>, vector<12x8xf32>, vector<12x8xf32> -> vector<12x32xf32>
    %c0_14 = arith.constant 0 : index
    %c0_15 = arith.constant 0 : index
    %c0_16 = arith.constant 0 : index
    %53 = vector.load %arg7[%c0_14, %c0_15, %c0_16] : memref<1x32x32xbf16, #tpu.memory_space<vmem>>, vector<1x32x32xbf16>
    %54 = vector.shape_cast %53 : vector<1x32x32xbf16> to vector<32x32xbf16>
    %55 = arith.truncf %52 : vector<12x32xf32> to vector<12x32xbf16>
    %cst_17 = arith.constant dense<0.000000e+00> : vector<12x32xf32>
    %56 = tpu.matmul %55, %54, %cst_17 {dimension_numbers = #tpu.dot_dimension_numbers<[1], [0], [0], [1], [0, 0, 1, 1], [], []>} : vector<12x32xbf16>, vector<32x32xbf16>, vector<12x32xf32> -> vector<12x32xf32>
    %c0_18 = arith.constant 0 : index
    %c0_19 = arith.constant 0 : index
    %c0_20 = arith.constant 0 : index
    %57 = vector.load %arg8[%c0_18, %c0_19, %c0_20] : memref<1x1x32xf32, #tpu.memory_space<vmem>>, vector<1x1x32xf32>
    %58 = vector.shape_cast %57 : vector<1x1x32xf32> to vector<1x32xf32>
    %59 = vector.broadcast %58 : vector<1x32xf32> to vector<12x32xf32>
    %60 = arith.addf %56, %59 : vector<12x32xf32>
    %61 = arith.addf %3, %60 : vector<12x32xf32>
    %c0_21 = arith.constant 0 : index
    %c0_22 = arith.constant 0 : index
    %c0_23 = arith.constant 0 : index
    %62 = vector.load %arg9[%c0_21, %c0_22, %c0_23] : memref<1x1x32xf32, #tpu.memory_space<vmem>>, vector<1x1x32xf32>
    %63 = vector.shape_cast %62 : vector<1x1x32xf32> to vector<1x32xf32>
    %c0_24 = arith.constant 0 : index
    %c0_25 = arith.constant 0 : index
    %c0_26 = arith.constant 0 : index
    %64 = vector.load %arg10[%c0_24, %c0_25, %c0_26] : memref<1x1x32xf32, #tpu.memory_space<vmem>>, vector<1x1x32xf32>
    %65 = vector.shape_cast %64 : vector<1x1x32xf32> to vector<1x32xf32>
    %cst_27 = arith.constant dense<0.000000e+00> : vector<12xf32>
    %66 = vector.multi_reduction <add>, %61, %cst_27 [1] : vector<12x32xf32> to vector<12xf32>
    %67 = vector.shape_cast %66 : vector<12xf32> to vector<12x1xf32>
    %cst_28 = arith.constant 3.200000e+01 : f32
    %68 = vector.broadcast %cst_28 : f32 to vector<12x1xf32>
    %69 = arith.divf %67, %68 : vector<12x1xf32>
    %70 = vector.broadcast %69 : vector<12x1xf32> to vector<12x32xf32>
    %71 = arith.subf %61, %70 : vector<12x32xf32>
    %72 = arith.mulf %71, %71 : vector<12x32xf32>
    %cst_29 = arith.constant dense<0.000000e+00> : vector<12xf32>
    %73 = vector.multi_reduction <add>, %72, %cst_29 [1] : vector<12x32xf32> to vector<12xf32>
    %74 = vector.shape_cast %73 : vector<12xf32> to vector<12x1xf32>
    %cst_30 = arith.constant 3.200000e+01 : f32
    %75 = vector.broadcast %cst_30 : f32 to vector<12x1xf32>
    %76 = arith.divf %74, %75 : vector<12x1xf32>
    %77 = vector.broadcast %69 : vector<12x1xf32> to vector<12x32xf32>
    %78 = arith.subf %61, %77 : vector<12x32xf32>
    %cst_31 = arith.constant 9.99999974E-6 : f32
    %79 = vector.broadcast %cst_31 : f32 to vector<12x1xf32>
    %80 = arith.addf %76, %79 : vector<12x1xf32>
    %81 = math.rsqrt %80 : vector<12x1xf32>
    %82 = vector.broadcast %81 : vector<12x1xf32> to vector<12x32xf32>
    %83 = arith.mulf %78, %82 : vector<12x32xf32>
    %84 = vector.broadcast %63 : vector<1x32xf32> to vector<12x32xf32>
    %85 = arith.mulf %83, %84 : vector<12x32xf32>
    %86 = vector.broadcast %65 : vector<1x32xf32> to vector<12x32xf32>
    %87 = arith.addf %85, %86 : vector<12x32xf32>
    %c0_32 = arith.constant 0 : index
    %c0_33 = arith.constant 0 : index
    %c0_34 = arith.constant 0 : index
    %88 = vector.load %arg11[%c0_32, %c0_33, %c0_34] : memref<1x32x64xbf16, #tpu.memory_space<vmem>>, vector<1x32x64xbf16>
    %89 = vector.shape_cast %88 : vector<1x32x64xbf16> to vector<32x64xbf16>
    %90 = arith.truncf %87 : vector<12x32xf32> to vector<12x32xbf16>
    %cst_35 = arith.constant dense<0.000000e+00> : vector<12x64xf32>
    %91 = tpu.matmul %90, %89, %cst_35 {dimension_numbers = #tpu.dot_dimension_numbers<[1], [0], [0], [1], [0, 0, 1, 1], [], []>} : vector<12x32xbf16>, vector<32x64xbf16>, vector<12x64xf32> -> vector<12x64xf32>
    %c0_36 = arith.constant 0 : index
    %c0_37 = arith.constant 0 : index
    %c0_38 = arith.constant 0 : index
    %92 = vector.load %arg12[%c0_36, %c0_37, %c0_38] : memref<1x1x64xf32, #tpu.memory_space<vmem>>, vector<1x1x64xf32>
    %93 = vector.shape_cast %92 : vector<1x1x64xf32> to vector<1x64xf32>
    %94 = vector.broadcast %93 : vector<1x64xf32> to vector<12x64xf32>
    %95 = arith.addf %91, %94 : vector<12x64xf32>
    %96 = arith.mulf %95, %95 : vector<12x64xf32>
    %97 = arith.mulf %95, %96 : vector<12x64xf32>
    %cst_39 = arith.constant 4.471500e-02 : f32
    %98 = vector.broadcast %cst_39 : f32 to vector<12x64xf32>
    %99 = arith.mulf %98, %97 : vector<12x64xf32>
    %100 = arith.addf %95, %99 : vector<12x64xf32>
    %cst_40 = arith.constant 0.797884583 : f32
    %101 = vector.broadcast %cst_40 : f32 to vector<12x64xf32>
    %102 = arith.mulf %101, %100 : vector<12x64xf32>
    %103 = math.tanh %102 : vector<12x64xf32>
    %cst_41 = arith.constant 1.000000e+00 : f32
    %104 = vector.broadcast %cst_41 : f32 to vector<12x64xf32>
    %105 = arith.addf %104, %103 : vector<12x64xf32>
    %cst_42 = arith.constant 5.000000e-01 : f32
    %106 = vector.broadcast %cst_42 : f32 to vector<12x64xf32>
    %107 = arith.mulf %106, %105 : vector<12x64xf32>
    %108 = arith.mulf %95, %107 : vector<12x64xf32>
    %c0_43 = arith.constant 0 : index
    %c0_44 = arith.constant 0 : index
    %c0_45 = arith.constant 0 : index
    %109 = vector.load %arg13[%c0_43, %c0_44, %c0_45] : memref<1x64x32xbf16, #tpu.memory_space<vmem>>, vector<1x64x32xbf16>
    %110 = vector.shape_cast %109 : vector<1x64x32xbf16> to vector<64x32xbf16>
    %111 = arith.truncf %108 : vector<12x64xf32> to vector<12x64xbf16>
    %cst_46 = arith.constant dense<0.000000e+00> : vector<12x32xf32>
    %112 = tpu.matmul %111, %110, %cst_46 {dimension_numbers = #tpu.dot_dimension_numbers<[1], [0], [0], [1], [0, 0, 1, 1], [], []>} : vector<12x64xbf16>, vector<64x32xbf16>, vector<12x32xf32> -> vector<12x32xf32>
    %c0_47 = arith.constant 0 : index
    %c0_48 = arith.constant 0 : index
    %c0_49 = arith.constant 0 : index
    %113 = vector.load %arg14[%c0_47, %c0_48, %c0_49] : memref<1x1x32xf32, #tpu.memory_space<vmem>>, vector<1x1x32xf32>
    %114 = vector.shape_cast %113 : vector<1x1x32xf32> to vector<1x32xf32>
    %115 = vector.broadcast %114 : vector<1x32xf32> to vector<12x32xf32>
    %116 = arith.addf %112, %115 : vector<12x32xf32>
    %117 = arith.addf %87, %116 : vector<12x32xf32>
    %c0_50 = arith.constant 0 : index
    %c0_51 = arith.constant 0 : index
    %c0_52 = arith.constant 0 : index
    %118 = vector.load %arg15[%c0_50, %c0_51, %c0_52] : memref<1x1x32xf32, #tpu.memory_space<vmem>>, vector<1x1x32xf32>
    %119 = vector.shape_cast %118 : vector<1x1x32xf32> to vector<1x32xf32>
    %c0_53 = arith.constant 0 : index
    %c0_54 = arith.constant 0 : index
    %c0_55 = arith.constant 0 : index
    %120 = vector.load %arg16[%c0_53, %c0_54, %c0_55] : memref<1x1x32xf32, #tpu.memory_space<vmem>>, vector<1x1x32xf32>
    %121 = vector.shape_cast %120 : vector<1x1x32xf32> to vector<1x32xf32>
    %cst_56 = arith.constant dense<0.000000e+00> : vector<12xf32>
    %122 = vector.multi_reduction <add>, %117, %cst_56 [1] : vector<12x32xf32> to vector<12xf32>
    %123 = vector.shape_cast %122 : vector<12xf32> to vector<12x1xf32>
    %cst_57 = arith.constant 3.200000e+01 : f32
    %124 = vector.broadcast %cst_57 : f32 to vector<12x1xf32>
    %125 = arith.divf %123, %124 : vector<12x1xf32>
    %126 = vector.broadcast %125 : vector<12x1xf32> to vector<12x32xf32>
    %127 = arith.subf %117, %126 : vector<12x32xf32>
    %128 = arith.mulf %127, %127 : vector<12x32xf32>
    %cst_58 = arith.constant dense<0.000000e+00> : vector<12xf32>
    %129 = vector.multi_reduction <add>, %128, %cst_58 [1] : vector<12x32xf32> to vector<12xf32>
    %130 = vector.shape_cast %129 : vector<12xf32> to vector<12x1xf32>
    %cst_59 = arith.constant 3.200000e+01 : f32
    %131 = vector.broadcast %cst_59 : f32 to vector<12x1xf32>
    %132 = arith.divf %130, %131 : vector<12x1xf32>
    %133 = vector.broadcast %125 : vector<12x1xf32> to vector<12x32xf32>
    %134 = arith.subf %117, %133 : vector<12x32xf32>
    %cst_60 = arith.constant 9.99999974E-6 : f32
    %135 = vector.broadcast %cst_60 : f32 to vector<12x1xf32>
    %136 = arith.addf %132, %135 : vector<12x1xf32>
    %137 = math.rsqrt %136 : vector<12x1xf32>
    %138 = vector.broadcast %137 : vector<12x1xf32> to vector<12x32xf32>
    %139 = arith.mulf %134, %138 : vector<12x32xf32>
    %140 = vector.broadcast %119 : vector<1x32xf32> to vector<12x32xf32>
    %141 = arith.mulf %139, %140 : vector<12x32xf32>
    %142 = vector.broadcast %121 : vector<1x32xf32> to vector<12x32xf32>
    %143 = arith.addf %141, %142 : vector<12x32xf32>
    %c0_61 = arith.constant 0 : index
    %c0_62 = arith.constant 0 : index
    %144 = vector.load %arg20[%c0_61, %c0_62] : memref<12x32xf32, #tpu.memory_space<vmem>>, vector<12x32xf32>
    tpu.vector_store %arg20[%c0_61, %c0_62], %143 {strides = array<i32>} : memref<12x32xf32, #tpu.memory_space<vmem>>, vector<12x32xf32>,
    %c1_i32 = arith.constant 1 : i32
    %145 = arith.cmpi eq, %arg0, %c1_i32 : i32
    %146 = arith.extui %145 : i1 to i32
    %c0_i32_63 = arith.constant 0 : i32
    %147 = arith.cmpi ne, %146, %c0_i32_63 : i32
    scf.if %147 {
      %148 = vector.extract_strided_slice %143 {offsets = [0, 0], sizes = [4, 32], strides = [1, 1]} : vector<12x32xf32> to vector<4x32xf32>
      %149 = vector.extract_strided_slice %143 {offsets = [4, 0], sizes = [4, 32], strides = [1, 1]} : vector<12x32xf32> to vector<4x32xf32>
      %150 = vector.extract_strided_slice %143 {offsets = [8, 0], sizes = [4, 32], strides = [1, 1]} : vector<12x32xf32> to vector<4x32xf32>
      %151 = tpu.concatenate %148, %149, %150 in 1 : vector<4x32xf32>, vector<4x32xf32>, vector<4x32xf32> -> vector<4x96xf32>
      %c0_64 = arith.constant 0 : index
      %c0_65 = arith.constant 0 : index
      %152 = vector.load %arg17[%c0_64, %c0_65] : memref<96x96xbf16, #tpu.memory_space<vmem>>, vector<96x96xbf16>
      %153 = arith.truncf %151 : vector<4x96xf32> to vector<4x96xbf16>
      %cst_66 = arith.constant dense<0.000000e+00> : vector<4x96xf32>
      %154 = tpu.matmul %153, %152, %cst_66 {dimension_numbers = #tpu.dot_dimension_numbers<[1], [0], [0], [1], [0, 0, 1, 1], [], []>} : vector<4x96xbf16>, vector<96x96xbf16>, vector<4x96xf32> -> vector<4x96xf32>
      %c0_67 = arith.constant 0 : index
      %c0_68 = arith.constant 0 : index
      %155 = vector.load %arg18[%c0_67, %c0_68] : memref<1x96xf32, #tpu.memory_space<vmem>>, vector<1x96xf32>
      %156 = vector.broadcast %155 : vector<1x96xf32> to vector<4x96xf32>
      %157 = arith.addf %154, %156 : vector<4x96xf32>
      %158 = vector.extract_strided_slice %157 {offsets = [0, 0], sizes = [4, 32], strides = [1, 1]} : vector<4x96xf32> to vector<4x32xf32>
      %159 = arith.mulf %158, %158 : vector<4x32xf32>
      %cst_69 = arith.constant dense<0.000000e+00> : vector<4xf32>
      %160 = vector.multi_reduction <add>, %159, %cst_69 [1] : vector<4x32xf32> to vector<4xf32>
      %161 = vector.shape_cast %160 : vector<4xf32> to vector<4x1xf32>
      %cst_70 = arith.constant 1.000000e-24 : f32
      %162 = vector.broadcast %cst_70 : f32 to vector<4x1xf32>
      %163 = arith.maximumf %161, %162 : vector<4x1xf32>
      %164 = math.rsqrt %163 : vector<4x1xf32>
      %165 = vector.broadcast %164 : vector<4x1xf32> to vector<4x32xf32>
      %166 = arith.mulf %158, %165 : vector<4x32xf32>
      %167 = vector.extract_strided_slice %157 {offsets = [0, 32], sizes = [4, 32], strides = [1, 1]} : vector<4x96xf32> to vector<4x32xf32>
      %168 = arith.mulf %167, %167 : vector<4x32xf32>
      %cst_71 = arith.constant dense<0.000000e+00> : vector<4xf32>
      %169 = vector.multi_reduction <add>, %168, %cst_71 [1] : vector<4x32xf32> to vector<4xf32>
      %170 = vector.shape_cast %169 : vector<4xf32> to vector<4x1xf32>
      %cst_72 = arith.constant 1.000000e-24 : f32
      %171 = vector.broadcast %cst_72 : f32 to vector<4x1xf32>
      %172 = arith.maximumf %170, %171 : vector<4x1xf32>
      %173 = math.rsqrt %172 : vector<4x1xf32>
      %174 = vector.broadcast %173 : vector<4x1xf32> to vector<4x32xf32>
      %175 = arith.mulf %167, %174 : vector<4x32xf32>
      %176 = vector.extract_strided_slice %157 {offsets = [0, 64], sizes = [4, 32], strides = [1, 1]} : vector<4x96xf32> to vector<4x32xf32>
      %177 = arith.mulf %176, %176 : vector<4x32xf32>
      %cst_73 = arith.constant dense<0.000000e+00> : vector<4xf32>
      %178 = vector.multi_reduction <add>, %177, %cst_73 [1] : vector<4x32xf32> to vector<4xf32>
      %179 = vector.shape_cast %178 : vector<4xf32> to vector<4x1xf32>
      %cst_74 = arith.constant 1.000000e-24 : f32
      %180 = vector.broadcast %cst_74 : f32 to vector<4x1xf32>
      %181 = arith.maximumf %179, %180 : vector<4x1xf32>
      %182 = math.rsqrt %181 : vector<4x1xf32>
      %183 = vector.broadcast %182 : vector<4x1xf32> to vector<4x32xf32>
      %184 = arith.mulf %176, %183 : vector<4x32xf32>
      %cst_75 = arith.constant 0.000000e+00 : f32
      %185 = vector.broadcast %cst_75 : f32 to vector<4x32xf32>
      %186 = tpu.concatenate %166, %175, %184, %185 in 1 : vector<4x32xf32>, vector<4x32xf32>, vector<4x32xf32>, vector<4x32xf32> -> vector<4x128xf32>
      %c0_76 = arith.constant 0 : index
      %c0_77 = arith.constant 0 : index
      %187 = vector.load %arg19[%c0_76, %c0_77] : memref<4x128xf32, #tpu.memory_space<vmem>>, vector<4x128xf32>
      tpu.vector_store %arg19[%c0_76, %c0_77], %186 {strides = array<i32>} : memref<4x128xf32, #tpu.memory_space<vmem>>, vector<4x128xf32>,
    } else {
    }
    return
  }
  func.func @transform_0(%arg0: i32) -> (i32, i32) {
    %c0_i32 = arith.constant 0 : i32
    %c0_i32_0 = arith.constant 0 : i32
    %c0_i32_1 = arith.constant 0 : i32
    return %c0_i32, %c0_i32_0 : i32, i32
  }
  func.func @transform_1(%arg0: i32) -> (i32, i32) {
    %c0_i32 = arith.constant 0 : i32
    %c0_i32_0 = arith.constant 0 : i32
    %c0_i32_1 = arith.constant 0 : i32
    return %c0_i32, %c0_i32_0 : i32, i32
  }
  func.func @transform_2(%arg0: i32) -> (i32, i32) {
    %c0_i32 = arith.constant 0 : i32
    %c0_i32_0 = arith.constant 0 : i32
    %c0_i32_1 = arith.constant 0 : i32
    return %c0_i32, %c0_i32_0 : i32, i32
  }
  func.func @transform_3(%arg0: i32) -> (i32, i32) {
    %c0_i32 = arith.constant 0 : i32
    %c0_i32_0 = arith.constant 0 : i32
    %c0_i32_1 = arith.constant 0 : i32
    return %c0_i32, %c0_i32_0 : i32, i32
  }
  func.func @transform_4(%arg0: i32) -> (i32, i32, i32) {
    %c0_i32 = arith.constant 0 : i32
    %c0_i32_0 = arith.constant 0 : i32
    %c0_i32_1 = arith.constant 0 : i32
    return %arg0, %c0_i32, %c0_i32_0 : i32, i32, i32
  }
  func.func @transform_5(%arg0: i32) -> (i32, i32, i32) {
    %c0_i32 = arith.constant 0 : i32
    %c0_i32_0 = arith.constant 0 : i32
    %c0_i32_1 = arith.constant 0 : i32
    return %arg0, %c0_i32, %c0_i32_0 : i32, i32, i32
  }
  func.func @transform_6(%arg0: i32) -> (i32, i32, i32) {
    %c0_i32 = arith.constant 0 : i32
    %c0_i32_0 = arith.constant 0 : i32
    %c0_i32_1 = arith.constant 0 : i32
    return %arg0, %c0_i32, %c0_i32_0 : i32, i32, i32
  }
  func.func @transform_7(%arg0: i32) -> (i32, i32, i32) {
    %c0_i32 = arith.constant 0 : i32
    %c0_i32_0 = arith.constant 0 : i32
    %c0_i32_1 = arith.constant 0 : i32
    return %arg0, %c0_i32, %c0_i32_0 : i32, i32, i32
  }
  func.func @transform_8(%arg0: i32) -> (i32, i32, i32) {
    %c0_i32 = arith.constant 0 : i32
    %c0_i32_0 = arith.constant 0 : i32
    %c0_i32_1 = arith.constant 0 : i32
    return %arg0, %c0_i32, %c0_i32_0 : i32, i32, i32
  }
  func.func @transform_9(%arg0: i32) -> (i32, i32, i32) {
    %c0_i32 = arith.constant 0 : i32
    %c0_i32_0 = arith.constant 0 : i32
    %c0_i32_1 = arith.constant 0 : i32
    return %arg0, %c0_i32, %c0_i32_0 : i32, i32, i32
  }
  func.func @transform_10(%arg0: i32) -> (i32, i32, i32) {
    %c0_i32 = arith.constant 0 : i32
    %c0_i32_0 = arith.constant 0 : i32
    %c0_i32_1 = arith.constant 0 : i32
    return %arg0, %c0_i32, %c0_i32_0 : i32, i32, i32
  }
  func.func @transform_11(%arg0: i32) -> (i32, i32, i32) {
    %c0_i32 = arith.constant 0 : i32
    %c0_i32_0 = arith.constant 0 : i32
    %c0_i32_1 = arith.constant 0 : i32
    return %arg0, %c0_i32, %c0_i32_0 : i32, i32, i32
  }
  func.func @transform_12(%arg0: i32) -> (i32, i32, i32) {
    %c0_i32 = arith.constant 0 : i32
    %c0_i32_0 = arith.constant 0 : i32
    %c0_i32_1 = arith.constant 0 : i32
    return %arg0, %c0_i32, %c0_i32_0 : i32, i32, i32
  }
  func.func @transform_13(%arg0: i32) -> (i32, i32, i32) {
    %c0_i32 = arith.constant 0 : i32
    %c0_i32_0 = arith.constant 0 : i32
    %c0_i32_1 = arith.constant 0 : i32
    return %arg0, %c0_i32, %c0_i32_0 : i32, i32, i32
  }
  func.func @transform_14(%arg0: i32) -> (i32, i32, i32) {
    %c0_i32 = arith.constant 0 : i32
    %c0_i32_0 = arith.constant 0 : i32
    %c0_i32_1 = arith.constant 0 : i32
    return %arg0, %c0_i32, %c0_i32_0 : i32, i32, i32
  }
  func.func @transform_15(%arg0: i32) -> (i32, i32, i32) {
    %c0_i32 = arith.constant 0 : i32
    %c0_i32_0 = arith.constant 0 : i32
    %c0_i32_1 = arith.constant 0 : i32
    return %arg0, %c0_i32, %c0_i32_0 : i32, i32, i32
  }
  func.func @transform_16(%arg0: i32) -> (i32, i32) {
    %c0_i32 = arith.constant 0 : i32
    %c0_i32_0 = arith.constant 0 : i32
    %c0_i32_1 = arith.constant 0 : i32
    return %c0_i32, %c0_i32_0 : i32, i32
  }
  func.func @transform_17(%arg0: i32) -> (i32, i32) {
    %c0_i32 = arith.constant 0 : i32
    %c0_i32_0 = arith.constant 0 : i32
    %c0_i32_1 = arith.constant 0 : i32
    return %c0_i32, %c0_i32_0 : i32, i32
  }
  func.func @transform_18(%arg0: i32) -> (i32, i32) {
    %c0_i32 = arith.constant 0 : i32
    %c0_i32_0 = arith.constant 0 : i32
    %c0_i32_1 = arith.constant 0 : i32
    return %c0_i32, %c0_i32_0 : i32, i32
  }
}

</mosaic_0001>

<bundles_post_ra>
// kernel: cman_forward.1
= control target key start
LH: loop header
LB: loop body
LE: loop exit
PB: predicated region body
PF: predicated region fallthrough
CT: control target
= control target key end

     0   :  { %s3771_s0 = inlined_call_operand.vmem [shape: f32[4,144], index: 0, kind: input, shape index: {}]   ;;  %s3772_s1 = inlined_call_operand.vmem [shape: f32[48,48], index: 1, kind: input, shape index: {}]   ;;  %s3773_s2 = inlined_call_operand.vmem [shape: bf16[144,96], index: 2, kind: input, shape index: {}]   ;;  %s3774_s3 = inlined_call_operand.hbm [shape: f32[1,96], index: 3, kind: input, shape index: {}]   ;;  %s3775_s4 = inlined_call_operand.vmem [shape: bf16[2,32,96], index: 4, kind: input, shape index: {}]   ;;  %s3776_s5 = inlined_call_operand.hbm [shape: f32[2,1,96], index: 5, kind: input, shape index: {}]   ;;  %s3777_s6 = inlined_call_operand.vmem [shape: bf16[2,32,32], index: 6, kind: input, shape index: {}]   ;;  %s3778_s7 = inlined_call_operand.hbm [shape: f32[2,1,32], index: 7, kind: input, shape index: {}]   ;;  %s3779_s8 = inlined_call_operand.hbm [shape: f32[2,1,32], index: 8, kind: input, shape index: {}]   ;;  %s3780_s9 = inlined_call_operand.hbm [shape: f32[2,1,32], index: 9, kind: input, shape index: {}]   ;;  %s3781_s10 = inlined_call_operand.hbm [shape: bf16[2,32,64], index: 10, kind: input, shape index: {}]   ;;  %s3782_s11 = inlined_call_operand.hbm [shape: f32[2,1,64], index: 11, kind: input, shape index: {}]   ;;  %s3783_s12 = inlined_call_operand.vmem [shape: bf16[2,64,32], index: 12, kind: input, shape index: {}]   ;;  %s3784_s13 = inlined_call_operand.hbm [shape: f32[2,1,32], index: 13, kind: input, shape index: {}]   ;;  %s3785_s14 = inlined_call_operand.hbm [shape: f32[2,1,32], index: 14, kind: input, shape index: {}]   ;;  %s3786_s15 = inlined_call_operand.hbm [shape: f32[2,1,32], index: 15, kind: input, shape index: {}]   ;;  %s3787_s16 = inlined_call_operand.vmem [shape: bf16[96,96], index: 16, kind: input, shape index: {}]   ;;  %s3788_s17 = inlined_call_operand.hbm [shape: f32[1,96], index: 17, kind: input, shape index: {}]   ;;  %s3789_s18 = inlined_call_operand.vmem [shape: f32[4,128], index: 18, kind: output, shape index: {}]  }
   0x1   :  { %3807 = sst [smem:[#allocation30_spill]] %s3771_s0 }
   0x2   :  { %3808 = sst [smem:[#allocation31_spill]] %s3772_s1 }
   0x3   :  { %3809 = sst [smem:[#allocation32_spill]] %s3773_s2 }
   0x4   :  { %3810 = sst [smem:[#allocation33_spill]] %s3775_s4 }
   0x5   :  { %3811 = sst [smem:[#allocation34_spill]] %s3776_s5 }
   0x6   :  { %3812 = sst [smem:[#allocation35_spill]] %s3777_s6 }
   0x7   :  { %3813 = sst [smem:[#allocation36_spill]] %s3779_s8 }
   0x8   :  { %3814 = sst [smem:[#allocation37_spill]] %s3781_s10 }
   0x9   :  { %3815 = sst [smem:[#allocation38_spill]] %s3783_s12 }
   0xa   :  { %3816 = sst [smem:[#allocation39_spill]] %s3787_s16 }
   0xb   :  { %3817 = sst [smem:[#allocation40_spill]] %s3788_s17 }
   0xc   :  { %3818 = sst [smem:[#allocation41_spill]] %s3789_s18 }
   0xd   :  { %23 = vsyncpa [#allocation4], 0 }
   0xe   :  { %24 = vsyncpa [#allocation6], 0 }
   0xf   :  { %26 = vsyncpa [#allocation6 + $0x1], 0 }
  0x10   :  { %27 = vsyncpa [#allocation9], 0 }
  0x11   :  { %29 = vsyncpa [#allocation9 + $0x1], 0 }
  0x12   :  { %30 = vsyncpa [#allocation12], 0 }
  0x13   :  { %32 = vsyncpa [#allocation12 + $0x1], 0 }
  0x14   :  { %33 = vsyncpa [#allocation15], 0 }
  0x15   :  { %35 = vsyncpa [#allocation15 + $0x1], 0 }
  0x16   :  { %36 = vsyncpa [#allocation18], 0 }
  0x17   :  { %38 = vsyncpa [#allocation18 + $0x1], 0  ;;  %s3093_s27 = smov 0   ;;  %s3095_s28 = smov 0  }
  0x18   :  { %s3097_s29 = smov 0   ;;  %s3099_s30 = smov 0  }
  0x19 LB: > { %3819 = sst [smem:[#allocation27_spill]] %s2961_s29  ;;  %s3112_s0 = sadd.s32 4294967295, %s2965_s30   ;;  %s2965_s30 = sphi %s3099_s30, %s3867_s30   ;;  %s2961_s29 = sphi %s3097_s29, %s3869_s29   ;;  %s2957_s28 = sphi %s3095_s28, %s3871_s28   ;;  %s2953_s27 = sphi %s3093_s27, %s3870_s27  }
  0x1a   : > { %s3115_s19 = sadd.s32 1, %s2965_s30   ;;  %s161_s20 = sadd.s32 1, %s2961_s29 }
  0x1b   : > { %3820 = sst [smem:[#allocation28_spill]] %s3115_s19  ;;  %s158_s1 = ssub.s32 %s2965_s30, %s3115_s19 }
  0x1c   : > { %p159_p0 = scmp.eq.s32.totalorder %s158_s1, 0  ;;  %p168_p1 = scmp.ne.s32.totalorder %s2961_s29, %s2957_s28 }
  0x1d   : > { %p169_p2 = scmp.eq.s32.totalorder %s2965_s30, 0  ;;  %p174_p3 = scmp.ne.s32.totalorder %s2957_s28, %s2953_s27 }
  0x1e   : > { %s3125_s21 = scalar_select %p159_p0, %s2961_s29, %s161_s20  }
  0x1f   : > { %p3127_p4 = por %p169_p2, %p168_p1  ;;  %p3796_p5 = scmp.eq.s32.totalorder %s3112_s0, 0 }
  0x20   : > { %3821 = sst [smem:[#allocation29_spill]] %s3125_s21  ;;  %p2172_p6 = scmp.ge.s32.totalorder %s2965_s30, 1 }
  0x21   : > { %p508_p7 = scmp.lt.s32.totalorder %s2965_s30, 3  ;;  %p3136_p8 = por %p3796_p5, %p174_p3 }
  0x22   : > { %s2967_s24 = smov [#allocation19]   ;;  %p2436_p12 = scmp.lt.s32.totalorder %s2965_s30, 2 }
  0x23   : > { %s3823_s2 = scalar_select %p3136_p8, 1, 0 }
  0x24   : > { %p3141_p10 = pnand %p2172_p6, %p508_p7  ;;  %s544_s25 = sshll.u32 %s2967_s24, 4  ;;  %s545_s25 = int_to_ptr.vmem [resolvable:$true] %s544_s25 }
  0x25   : > { %s3149_s26 = sand.u32 1, %s2961_s29   ;;  %s3158_s1 = sand.u32 1, %s2965_s30  }
  0x26   : > { %s3824_s23 = scalar_select %p3141_p10, 1, 0 }
  0x27   : > { %p2399_p11 = pneg %p3141_p10  ;;  %p3162_p0 = pnand %p2436_p12, %p3127_p4 }
  0x28   : > { %s3827_s17 = sld [smem:[#allocation40_spill]] }
  0x29   : > { %p3153_p13 = pnand %p2399_p11, %p3796_p5 }
  0x2a   : > { %s3826_s20 = scalar_select %p3162_p0, 1, 0 }
  0x2b   : > { %s3825_s27 = scalar_select %p3153_p13, 1, 0 }
  0x2c   : > { %p3800_p2 = pneg %p3153_p13 }
  0x2e   : > { %s2581_s19 = scalar_lea.hbm %s3827_s17, 16 }
  0x2f   : > { %p2582_p1 = scmp.ne.s32.totalorder %s3827_s17, %s2581_s19  ;;  %p2588_p4 = scmp.lt.u32.totalorder %s2581_s19, %s3827_s17 }
  0x31   : > { %p2584_p3 = pnand %p3800_p2, %p2582_p1 }
  0x33   : > { %p2585_p6 = pneg %p2584_p3 }
  0x35   : > { %p2590_p7 = pnand %p2588_p4, %p2585_p6 }
  0x37   : > { %2593 = shalt.err (!%p2590_p7)
}
  0x38   : > { %s2594_s12 = scalar_lea.vmem %s545_s25, 16  ;;  %s2601_s18 = scalar_lea.vmem %s545_s25, 32 }
  0x39   : > { %p2595_p11 = scmp.ne.s32.totalorder %s545_s25, %s2594_s12  ;;  %p2602_p5 = scmp.lt.s32.totalorder %s545_s25, %s545_s25 }
  0x3a   : > { %p2603_p8 = scmp.lt.s32.totalorder %s2601_s18, %s2594_s12 }
  0x3b   : > { %p2597_p12 = pnand %p2595_p11, %p3800_p2 }
  0x3c   : > { %p2604_p10 = por %p2603_p8, %p2602_p5 }
  0x3d   : > { %p2598_p9 = pneg %p2597_p12 }
  0x3f   : > { %p2605_p0 = pnand %p2604_p10, %p2598_p9 }
  0x41   : > { %2608 = shalt.err (!%p2605_p0)
}
  0x42   : > { %2405 = dma.hbm_to_vmem [thread:$0]  (!%p3153_p13), %s3827_s17, 16, %s545_s25, [#allocation18]  }
  0x43   : > { %s3189_s19 = sshll.u32 %s2965_s30, 4  ;;  %s3828_s5 = sld [smem:[#allocation34_spill]] }
  0x44   : > { %s566_s22 = scalar_lea.vmem [#allocation5], %s3149_s26  ;;  %p3829_p8 = scmp.ne.s32.totalorder %s3826_s20, 0 }
  0x45   : > { %s573_s18 = sshll.u32 %s566_s22, 4  ;;  %s3198_s18 = int_to_ptr.vmem [resolvable:$true] %s573_s18 }
  0x46   : > { %p3205_p9 = pneg %p3829_p8 }
  0x48   : > { %s3830_s25 = scalar_select %p3205_p9, 1, 0 }
  0x49   : > { %s3195_s12 = scalar_lea.hbm %s3828_s5, %s3189_s19  ;;  %s2614_s17 = scalar_lea.hbm %s3828_s5, 32 }
  0x4a   : > { %s2609_s16 = scalar_lea.hbm %s3195_s12, 16  ;;  %p2615_p1 = scmp.lt.u32.totalorder %s3195_s12, %s3828_s5 }
  0x4b   : > { %p2610_p5 = scmp.ne.s32.totalorder %s3195_s12, %s2609_s16  ;;  %p2616_p3 = scmp.lt.u32.totalorder %s2614_s17, %s2609_s16 }
  0x4c   : > { %p2618_p4 = scmp.lt.u32.totalorder %s2609_s16, %s3195_s12 }
  0x4d   : > { %p2612_p10 = pnand %p3205_p9, %p2610_p5  ;;  %p2617_p6 = por %p2616_p3, %p2615_p1 }
  0x4f   : > { %p2613_p0 = pneg %p2612_p10  ;;  %p2619_p7 = por %p2618_p4, %p2617_p6 }
  0x51   : > { %p2620_p11 = pnand %p2619_p7, %p2613_p0 }
  0x53   : > { %2623 = shalt.err (!%p2620_p11)
}
  0x54   : > { %s2624_s29 = scalar_lea.vmem %s3198_s18, 16  ;;  %s2968_s21 = smov [#allocation5]  }
  0x55   : > { %p2625_p12 = scmp.ne.s32.totalorder %s3198_s18, %s2624_s29  ;;  %s2629_s24 = sshll.u32 %s2968_s21, 4  ;;  %s2630_s24 = int_to_ptr.vmem [resolvable:$false] %s2629_s24 }
  0x56   : > { %s2631_s6 = scalar_lea.vmem %s2630_s24, 32  ;;  %p2632_p2 = scmp.lt.s32.totalorder %s3198_s18, %s2630_s24 }
  0x57   : > { %p2627_p5 = pnand %p2625_p12, %p3205_p9  ;;  %p2633_p13 = scmp.lt.s32.totalorder %s2631_s6, %s2624_s29 }
  0x59   : > { %p2628_p10 = pneg %p2627_p5  ;;  %p2634_p1 = por %p2633_p13, %p2632_p2 }
  0x5b   : > { %p2635_p3 = pnand %p2634_p1, %p2628_p10 }
  0x5d   : > { %2638 = shalt.err (!%p2635_p3)
}
  0x5e   : > { %s3831_s17 = scalar_lea.sflag [#allocation6], %s3158_s1  ;;  %s3832_s8 = sld [smem:[#allocation36_spill]] }
  0x5f   : > { %2409 = dma.hbm_to_vmem [thread:$0]  (!%p3829_p8), %s3195_s12, 16, %s3198_s18, %s3831_s17  }
  0x60   : > { %s608_s29 = scalar_lea.vmem [#allocation8], %s3149_s26  ;;  %s2180_s6 = sshll.u32 %s3149_s26, 4 }
  0x61   : > { %s615_s24 = sshll.u32 %s608_s29, 4  ;;  %s3803_s5 = scalar_lea.sflag [#allocation9], %s3158_s1  ;;  %s3237_s24 = int_to_ptr.vmem [resolvable:$true] %s615_s24 }
  0x64   : > { %s3234_s21 = scalar_lea.hbm %s3832_s8, %s3189_s19  ;;  %s2644_s17 = scalar_lea.hbm %s3832_s8, 32 }
  0x65   : > { %s2639_s4 = scalar_lea.hbm %s3234_s21, 16  ;;  %p2645_p6 = scmp.lt.u32.totalorder %s3234_s21, %s3832_s8 }
  0x66   : > { %p2640_p13 = scmp.ne.s32.totalorder %s3234_s21, %s2639_s4  ;;  %p2646_p4 = scmp.lt.u32.totalorder %s2644_s17, %s2639_s4 }
  0x67   : > { %p2648_p11 = scmp.lt.u32.totalorder %s2639_s4, %s3234_s21 }
  0x68   : > { %p2642_p2 = pnand %p2640_p13, %p3205_p9  ;;  %p2647_p7 = por %p2646_p4, %p2645_p6 }
  0x6a   : > { %p2643_p0 = pneg %p2642_p2  ;;  %p2649_p12 = por %p2648_p11, %p2647_p7 }
  0x6c   : > { %p2650_p5 = pnand %p2649_p12, %p2643_p0 }
  0x6e   : > { %2653 = shalt.err (!%p2650_p5)
}
  0x6f   : > { %s2654_s29 = scalar_lea.vmem %s3237_s24, 16  ;;  %s2969_s12 = smov [#allocation8]  }
  0x70   : > { %p2655_p10 = scmp.ne.s32.totalorder %s3237_s24, %s2654_s29  ;;  %s2659_s18 = sshll.u32 %s2969_s12, 4  ;;  %s2660_s18 = int_to_ptr.vmem [resolvable:$false] %s2659_s18 }
  0x71   : > { %s2661_s16 = scalar_lea.vmem %s2660_s18, 32  ;;  %p2662_p13 = scmp.lt.s32.totalorder %s3237_s24, %s2660_s18 }
  0x72   : > { %p2657_p1 = pnand %p2655_p10, %p3205_p9  ;;  %p2663_p2 = scmp.lt.s32.totalorder %s2661_s16, %s2654_s29 }
  0x74   : > { %p2658_p3 = pneg %p2657_p1  ;;  %p2664_p6 = por %p2663_p2, %p2662_p13 }
  0x76   : > { %p2665_p4 = pnand %p2664_p6, %p2658_p3 }
  0x78   : > { %2668 = shalt.err (!%p2665_p4)
}
  0x79   : > { %2415 = dma.hbm_to_vmem [thread:$0]  (!%p3829_p8), %s3234_s21, 16, %s3237_s24, %s3803_s5  }
  0x7a   : > { %s2248_s4 = sshll.u32 %s2965_s30, 8  ;;  %s3833_s10 = sld [smem:[#allocation37_spill]] }
  0x7b   : > { %s643_s29 = scalar_lea.vmem [#allocation11], %s2180_s6  ;;  %s640_s16 = scalar_lea.sflag [#allocation12], %s3158_s1 }
  0x7c   : > { %s650_s18 = sshll.u32 %s643_s29, 4  ;;  %s3272_s18 = int_to_ptr.vmem [resolvable:$true] %s650_s18 }
  0x80   : > { %s3268_s12 = scalar_lea.hbm %s3833_s10, %s2248_s4  ;;  %s2674_s24 = scalar_lea.hbm %s3833_s10, 512 }
  0x81   : > { %s2669_s8 = scalar_lea.hbm %s3268_s12, 256  ;;  %p2675_p12 = scmp.lt.u32.totalorder %s3268_s12, %s3833_s10 }
  0x82   : > { %p2670_p0 = scmp.ne.s32.totalorder %s3268_s12, %s2669_s8  ;;  %p2676_p5 = scmp.lt.u32.totalorder %s2674_s24, %s2669_s8 }
  0x83   : > { %p2678_p1 = scmp.lt.u32.totalorder %s2669_s8, %s3268_s12 }
  0x84   : > { %p2672_p7 = pnand %p2670_p0, %p3205_p9  ;;  %p2677_p10 = por %p2676_p5, %p2675_p12 }
  0x86   : > { %p2673_p11 = pneg %p2672_p7  ;;  %p2679_p3 = por %p2678_p1, %p2677_p10 }
  0x88   : > { %p2680_p13 = pnand %p2679_p3, %p2673_p11 }
  0x8a   : > { %2683 = shalt.err (!%p2680_p13)
}
  0x8b   : > { %s2684_s6 = scalar_lea.vmem %s3272_s18, 256  ;;  %s2970_s22 = smov [#allocation11]  }
  0x8c   : > { %p2685_p2 = scmp.ne.s32.totalorder %s3272_s18, %s2684_s6  ;;  %s2689_s29 = sshll.u32 %s2970_s22, 4  ;;  %s2690_s29 = int_to_ptr.vmem [resolvable:$false] %s2689_s29 }
  0x8d   : > { %s2691_s30 = scalar_lea.vmem %s2690_s29, 512  ;;  %p2692_p0 = scmp.lt.s32.totalorder %s3272_s18, %s2690_s29 }
  0x8e   : > { %p2687_p6 = pnand %p2685_p2, %p3205_p9  ;;  %p2693_p7 = scmp.lt.s32.totalorder %s2691_s30, %s2684_s6 }
  0x90   : > { %p2688_p4 = pneg %p2687_p6  ;;  %p2694_p12 = por %p2693_p7, %p2692_p0 }
  0x92   : > { %p2695_p5 = pnand %p2694_p12, %p2688_p4 }
  0x94   : > { %2698 = shalt.err (!%p2695_p5)
}
  0x95   : > { %s2971_s8 = smov 64   ;;  %s2972_s21 = smov 4  }
  0x96   : > { %2421 = dma.hbm_to_vmem [thread:$0]  (!%p3829_p8), %s3268_s12, 256, %s3272_s18, %s640_s16, %s2971_s8, %s2971_s8, %s2972_s21  }
  0x97   : > { %s3302_s17 = scalar_lea.hbm %s3784_s13, %s3189_s19  ;;  %s688_s6 = scalar_lea.vmem [#allocation14], %s3149_s26 }
  0x98   : > { %s695_s22 = sshll.u32 %s688_s6, 4  ;;  %s2973_s29 = smov [#allocation3]   ;;  %s3305_s22 = int_to_ptr.vmem [resolvable:$true] %s695_s22 }
  0x99   : > { %s3307_s30 = sshll.u32 %s2973_s29, 4  ;;  %s686_s5 = scalar_lea.sflag [#allocation15], %s3158_s1  ;;  %s531_s30 = int_to_ptr.vmem [resolvable:$true] %s3307_s30 }
  0x9a   : > { %s2699_s10 = scalar_lea.hbm %s3302_s17, 16  ;;  %s2704_s8 = scalar_lea.hbm %s3784_s13, 32 }
  0x9b   : > { %p2700_p11 = scmp.ne.s32.totalorder %s3302_s17, %s2699_s10  ;;  %p2705_p3 = scmp.lt.u32.totalorder %s3302_s17, %s3784_s13 }
  0x9c   : > { %p2706_p13 = scmp.lt.u32.totalorder %s2704_s8, %s2699_s10  ;;  %p2708_p6 = scmp.lt.u32.totalorder %s2699_s10, %s3302_s17 }
  0x9d   : > { %p2702_p10 = pnand %p2700_p11, %p3205_p9 }
  0x9e   : > { %p2707_p2 = por %p2706_p13, %p2705_p3 }
  0x9f   : > { %p2703_p1 = pneg %p2702_p10 }
  0xa0   : > { %p2709_p4 = por %p2708_p6, %p2707_p2 }
  0xa2   : > { %p2710_p0 = pnand %p2709_p4, %p2703_p1 }
  0xa4   : > { %2713 = shalt.err (!%p2710_p0)
}
  0xa5   : > { %s2714_s4 = scalar_lea.vmem %s3305_s22, 16  ;;  %s2974_s6 = smov [#allocation14]  }
  0xa6   : > { %p2715_p7 = scmp.ne.s32.totalorder %s3305_s22, %s2714_s4  ;;  %s2719_s29 = sshll.u32 %s2974_s6, 4  ;;  %s2720_s29 = int_to_ptr.vmem [resolvable:$false] %s2719_s29 }
  0xa7   : > { %s2721_s12 = scalar_lea.vmem %s2720_s29, 32  ;;  %p2722_p11 = scmp.lt.s32.totalorder %s3305_s22, %s2720_s29 }
  0xa8   : > { %p2717_p12 = pnand %p2715_p7, %p3205_p9  ;;  %p2723_p10 = scmp.lt.s32.totalorder %s2721_s12, %s2714_s4 }
  0xaa   : > { %p2718_p5 = pneg %p2717_p12  ;;  %p2724_p3 = por %p2723_p10, %p2722_p11 }
  0xac   : > { %p2725_p13 = pnand %p2724_p3, %p2718_p5 }
  0xae   : > { %2728 = shalt.err (!%p2725_p13)
}
  0xaf   : > { %2427 = dma.hbm_to_vmem [thread:$0]  (!%p3829_p8), %s3302_s17, 16, %s3305_s22, %s686_s5  }
  0xb0   : > { %s2729_s8 = scalar_lea.hbm %s3774_s3, 16  ;;  %p3834_p2 = scmp.ne.s32.totalorder %s3825_s27, 0 }
  0xb1   : > { %p2730_p1 = scmp.ne.s32.totalorder %s3774_s3, %s2729_s8  ;;  %p2736_p7 = scmp.lt.u32.totalorder %s2729_s8, %s3774_s3 }
  0xb2   : > { %p3835_p6 = pneg %p3834_p2 }
  0xb4   : > { %p2732_p4 = pnand %p2730_p1, %p3835_p6 }
  0xb6   : > { %p2733_p0 = pneg %p2732_p4 }
  0xb8   : > { %p2738_p12 = pnand %p2736_p7, %p2733_p0 }
  0xba   : > { %2741 = shalt.err (!%p2738_p12)
}
  0xbb   : > { %s2742_s17 = scalar_lea.vmem %s531_s30, 16  ;;  %p3836_p11 = pmov %p3835_p6 }
  0xbc   : > { %p2743_p5 = scmp.ne.s32.totalorder %s531_s30, %s2742_s17  ;;  %s2749_s22 = scalar_lea.vmem %s531_s30, 32 }
  0xbd   : > { %p2750_p13 = scmp.lt.s32.totalorder %s531_s30, %s531_s30  ;;  %p2751_p8 = scmp.lt.s32.totalorder %s2749_s22, %s2742_s17 }
  0xbe   : > { %p2745_p10 = pnand %p2743_p5, %p3836_p11 }
  0xbf   : > { %p2752_p9 = por %p2751_p8, %p2750_p13 }
  0xc0   : > { %p2746_p3 = pneg %p2745_p10 }
  0xc2   : > { %p2753_p1 = pnand %p2752_p9, %p2746_p3 }
  0xc4   : > { %2756 = shalt.err (!%p2753_p1)
}
  0xc5   : > { %2402 = dma.hbm_to_vmem [thread:$0]  (!%p3834_p2), %s3774_s3, 16, %s531_s30, [#allocation4]  }
  0xc6   : > { %s3358_s8 = scalar_lea.hbm %s3778_s7, %s3189_s19  ;;  %s591_s21 = scalar_lea.vmem [#allocation7], %s3149_s26 }
  0xc7   : > { %s598_s24 = sshll.u32 %s591_s21, 4  ;;  %s2757_s27 = scalar_lea.hbm %s3358_s8, 16  ;;  %s599_s24 = int_to_ptr.vmem [resolvable:$true] %s598_s24 }
  0xc8   : > { %p2758_p8 = scmp.ne.s32.totalorder %s3358_s8, %s2757_s27  ;;  %p3837_p9 = scmp.ne.s32.totalorder %s3830_s25, 0 }
  0xc9   : > { %s2762_s30 = scalar_lea.hbm %s3778_s7, 32  ;;  %p2763_p2 = scmp.lt.u32.totalorder %s3358_s8, %s3778_s7 }
  0xca   : > { %p2760_p6 = pnand %p2758_p8, %p3837_p9  ;;  %p2764_p0 = scmp.lt.u32.totalorder %s2762_s30, %s2757_s27 }
  0xcb   : > { %p2766_p12 = scmp.lt.u32.totalorder %s2757_s27, %s3358_s8 }
  0xcc   : > { %p2761_p4 = pneg %p2760_p6  ;;  %p2765_p7 = por %p2764_p0, %p2763_p2 }
  0xce   : > { %p2767_p5 = por %p2766_p12, %p2765_p7 }
  0xd0   : > { %p2768_p11 = pnand %p2767_p5, %p2761_p4 }
  0xd2   : > { %2771 = shalt.err (!%p2768_p11)
}
  0xd3   : > { %s2772_s29 = scalar_lea.vmem %s599_s24, 16  ;;  %s2975_s12 = smov [#allocation7]  }
  0xd4   : > { %p2773_p10 = scmp.ne.s32.totalorder %s599_s24, %s2772_s29  ;;  %s2777_s10 = sshll.u32 %s2975_s12, 4  ;;  %s2778_s10 = int_to_ptr.vmem [resolvable:$false] %s2777_s10 }
  0xd5   : > { %s2779_s18 = scalar_lea.vmem %s2778_s10, 32  ;;  %p2780_p1 = scmp.lt.s32.totalorder %s599_s24, %s2778_s10 }
  0xd6   : > { %p2775_p3 = pnand %p2773_p10, %p3837_p9  ;;  %p2781_p8 = scmp.lt.s32.totalorder %s2779_s18, %s2772_s29 }
  0xd8   : > { %p2776_p13 = pneg %p2775_p3  ;;  %p2782_p6 = por %p2781_p8, %p2780_p1 }
  0xda   : > { %p2783_p0 = pnand %p2782_p6, %p2776_p13 }
  0xdc   : > { %2786 = shalt.err (!%p2783_p0)
}
  0xdd   : > { %p3838_p2 = scmp.ne.s32.totalorder %s3826_s20, 0  ;;  %s3839_s21 = scalar_lea.sflag [#allocation6], %s3158_s1 }
  0xde   : > { %s3384_s6 = scalar_lea.hbm %s3780_s9, %s3189_s19  ;;  %s625_s30 = scalar_lea.vmem [#allocation10], %s3149_s26 }
  0xdf   : > { %2412 = dma.hbm_to_vmem [thread:$0]  (!%p3838_p2), %s3358_s8, 16, %s599_s24, %s3839_s21  }
  0xe0   : > { %s632_s17 = sshll.u32 %s625_s30, 4  ;;  %s2787_s22 = scalar_lea.hbm %s3384_s6, 16  ;;  %s633_s17 = int_to_ptr.vmem [resolvable:$true] %s632_s17 }
  0xe1   : > { %p2788_p4 = scmp.ne.s32.totalorder %s3384_s6, %s2787_s22  ;;  %s2792_s8 = scalar_lea.hbm %s3780_s9, 32 }
  0xe2   : > { %p2793_p5 = scmp.lt.u32.totalorder %s3384_s6, %s3780_s9  ;;  %p2794_p11 = scmp.lt.u32.totalorder %s2792_s8, %s2787_s22 }
  0xe3   : > { %p2790_p7 = pnand %p2788_p4, %p3837_p9  ;;  %p2796_p3 = scmp.lt.u32.totalorder %s2787_s22, %s3384_s6 }
  0xe4   : > { %p2795_p10 = por %p2794_p11, %p2793_p5 }
  0xe5   : > { %p2791_p12 = pneg %p2790_p7 }
  0xe6   : > { %p2797_p13 = por %p2796_p3, %p2795_p10 }
  0xe8   : > { %p2798_p1 = pnand %p2797_p13, %p2791_p12 }
  0xea   : > { %2801 = shalt.err (!%p2798_p1)
}
  0xeb   : > { %s2802_s18 = scalar_lea.vmem %s633_s17, 16  ;;  %s2976_s21 = smov [#allocation10]  }
  0xec   : > { %p2803_p8 = scmp.ne.s32.totalorder %s633_s17, %s2802_s18  ;;  %s2807_s27 = sshll.u32 %s2976_s21, 4  ;;  %s2808_s27 = int_to_ptr.vmem [resolvable:$false] %s2807_s27 }
  0xed   : > { %s2809_s4 = scalar_lea.vmem %s2808_s27, 32  ;;  %p2810_p4 = scmp.lt.s32.totalorder %s633_s17, %s2808_s27 }
  0xee   : > { %p2805_p6 = pnand %p2803_p8, %p3837_p9  ;;  %p2811_p7 = scmp.lt.s32.totalorder %s2809_s4, %s2802_s18 }
  0xf0   : > { %p2806_p0 = pneg %p2805_p6  ;;  %p2812_p2 = por %p2811_p7, %p2810_p4 }
  0xf2   : > { %p2813_p5 = pnand %p2812_p2, %p2806_p0 }
  0xf4   : > { %2816 = shalt.err (!%p2813_p5)
}
  0xf5   : > { %p3840_p11 = scmp.ne.s32.totalorder %s3826_s20, 0  ;;  %s3841_s30 = scalar_lea.sflag [#allocation9], %s3158_s1 }
  0xf6   : > { %s3410_s12 = scalar_lea.hbm %s3782_s11, %s3189_s19  ;;  %s663_s8 = scalar_lea.vmem [#allocation13], %s3149_s26 }
  0xf7   : > { %2418 = dma.hbm_to_vmem [thread:$0]  (!%p3840_p11), %s3384_s6, 16, %s633_s17, %s3841_s30  }
  0xf8   : > { %s670_s24 = sshll.u32 %s663_s8, 4  ;;  %s2817_s10 = scalar_lea.hbm %s3410_s12, 16  ;;  %s671_s24 = int_to_ptr.vmem [resolvable:$true] %s670_s24 }
  0xf9   : > { %p2818_p2 = scmp.ne.s32.totalorder %s3410_s12, %s2817_s10  ;;  %s2822_s6 = scalar_lea.hbm %s3782_s11, 32 }
  0xfa   : > { %p2823_p3 = scmp.lt.u32.totalorder %s3410_s12, %s3782_s11  ;;  %p2824_p13 = scmp.lt.u32.totalorder %s2822_s6, %s2817_s10 }
  0xfb   : > { %p2820_p12 = pnand %p2818_p2, %p3837_p9  ;;  %p2826_p8 = scmp.lt.u32.totalorder %s2817_s10, %s3410_s12 }
  0xfc   : > { %p2825_p1 = por %p2824_p13, %p2823_p3 }
  0xfd   : > { %p2821_p10 = pneg %p2820_p12 }
  0xfe   : > { %p2827_p6 = por %p2826_p8, %p2825_p1 }
 0x100   : > { %p2828_p0 = pnand %p2827_p6, %p2821_p10 }
 0x102   : > { %2831 = shalt.err (!%p2828_p0)
}
 0x103   : > { %s2832_s4 = scalar_lea.vmem %s671_s24, 16  ;;  %s2977_s30 = smov [#allocation13]  }
 0x104   : > { %p2833_p4 = scmp.ne.s32.totalorder %s671_s24, %s2832_s4  ;;  %s2837_s22 = sshll.u32 %s2977_s30, 4  ;;  %s2838_s22 = int_to_ptr.vmem [resolvable:$false] %s2837_s22 }
 0x105   : > { %s2839_s29 = scalar_lea.vmem %s2838_s22, 32  ;;  %p2840_p2 = scmp.lt.s32.totalorder %s671_s24, %s2838_s22 }
 0x106   : > { %p2835_p7 = pnand %p2833_p4, %p3837_p9  ;;  %p2841_p12 = scmp.lt.s32.totalorder %s2839_s29, %s2832_s4 }
 0x108   : > { %p2836_p5 = pneg %p2835_p7  ;;  %p2842_p11 = por %p2841_p12, %p2840_p2 }
 0x10a   : > { %p2843_p3 = pnand %p2842_p11, %p2836_p5 }
 0x10c   : > { %2846 = shalt.err (!%p2843_p3)
}
 0x10d   : > { %p3842_p13 = scmp.ne.s32.totalorder %s3826_s20, 0  ;;  %s3436_s18 = scalar_lea.hbm %s3785_s14, %s3189_s19 }
 0x10e   : > { %s705_s21 = scalar_lea.vmem [#allocation16], %s3149_s26  ;;  %s2847_s17 = scalar_lea.hbm %s3436_s18, 16 }
 0x10f   : > { %2424 = dma.hbm_to_vmem [thread:$0]  (!%p3842_p13), %s3410_s12, 16, %s671_s24, %s640_s16  }
 0x110   : > { %s712_s6 = sshll.u32 %s705_s21, 4  ;;  %p2848_p11 = scmp.ne.s32.totalorder %s3436_s18, %s2847_s17  ;;  %s713_s6 = int_to_ptr.vmem [resolvable:$true] %s712_s6 }
 0x111   : > { %s2852_s16 = scalar_lea.hbm %s3785_s14, 32  ;;  %p2853_p8 = scmp.lt.u32.totalorder %s3436_s18, %s3785_s14 }
 0x112   : > { %p2850_p10 = pnand %p2848_p11, %p3837_p9  ;;  %p2854_p6 = scmp.lt.u32.totalorder %s2852_s16, %s2847_s17 }
 0x113   : > { %p2856_p4 = scmp.lt.u32.totalorder %s2847_s17, %s3436_s18 }
 0x114   : > { %p2851_p1 = pneg %p2850_p10  ;;  %p2855_p0 = por %p2854_p6, %p2853_p8 }
 0x116   : > { %p2857_p7 = por %p2856_p4, %p2855_p0 }
 0x118   : > { %p2858_p5 = pnand %p2857_p7, %p2851_p1 }
 0x11a   : > { %2861 = shalt.err (!%p2858_p5)
}
 0x11b   : > { %s2862_s30 = scalar_lea.vmem %s713_s6, 16  ;;  %s2978_s22 = smov [#allocation16]  }
 0x11c   : > { %p2863_p2 = scmp.ne.s32.totalorder %s713_s6, %s2862_s30  ;;  %s2867_s29 = sshll.u32 %s2978_s22, 4  ;;  %s2868_s29 = int_to_ptr.vmem [resolvable:$false] %s2867_s29 }
 0x11d   : > { %s2869_s8 = scalar_lea.vmem %s2868_s29, 32  ;;  %p2870_p11 = scmp.lt.s32.totalorder %s713_s6, %s2868_s29 }
 0x11e   : > { %p2865_p12 = pnand %p2863_p2, %p3837_p9  ;;  %p2871_p10 = scmp.lt.s32.totalorder %s2869_s8, %s2862_s30 }
 0x120   : > { %p2866_p3 = pneg %p2865_p12  ;;  %p2872_p13 = por %p2871_p10, %p2870_p11 }
 0x122   : > { %p2873_p6 = pnand %p2872_p13, %p2866_p3 }
 0x124   : > { %2876 = shalt.err (!%p2873_p6)
}
 0x125   : > { %p3843_p8 = scmp.ne.s32.totalorder %s3826_s20, 0  ;;  %s3462_s17 = scalar_lea.hbm %s3786_s15, %s3189_s19 }
 0x126   : > { %s722_s27 = scalar_lea.vmem [#allocation17], %s3149_s26  ;;  %s720_s16 = scalar_lea.sflag [#allocation18], %s3158_s1 }
 0x127   : > { %2430 = dma.hbm_to_vmem [thread:$0]  (!%p3843_p8), %s3436_s18, 16, %s713_s6, %s686_s5  }
 0x128   : > { %s729_s4 = sshll.u32 %s722_s27, 4  ;;  %s2877_s12 = scalar_lea.hbm %s3462_s17, 16  ;;  %s730_s4 = int_to_ptr.vmem [resolvable:$true] %s729_s4 }
 0x129   : > { %p2878_p13 = scmp.ne.s32.totalorder %s3462_s17, %s2877_s12  ;;  %s2882_s18 = scalar_lea.hbm %s3786_s15, 32 }
 0x12a   : > { %p2883_p4 = scmp.lt.u32.totalorder %s3462_s17, %s3786_s15  ;;  %p2884_p7 = scmp.lt.u32.totalorder %s2882_s18, %s2877_s12 }
 0x12b   : > { %p2880_p1 = pnand %p2878_p13, %p3837_p9  ;;  %p2886_p2 = scmp.lt.u32.totalorder %s2877_s12, %s3462_s17 }
 0x12c   : > { %p2885_p5 = por %p2884_p7, %p2883_p4 }
 0x12d   : > { %p2881_p0 = pneg %p2880_p1 }
 0x12e   : > { %p2887_p12 = por %p2886_p2, %p2885_p5 }
 0x130   : > { %p2888_p3 = pnand %p2887_p12, %p2881_p0 }
 0x132   : > { %2891 = shalt.err (!%p2888_p3)
}
 0x133   : > { %s2892_s26 = scalar_lea.vmem %s730_s4, 16  ;;  %s2979_s1 = smov [#allocation17]  }
 0x134   : > { %p2893_p11 = scmp.ne.s32.totalorder %s730_s4, %s2892_s26  ;;  %s2897_s30 = sshll.u32 %s2979_s1, 4  ;;  %s2898_s30 = int_to_ptr.vmem [resolvable:$false] %s2897_s30 }
 0x135   : > { %s2899_s22 = scalar_lea.vmem %s2898_s30, 32  ;;  %p2900_p13 = scmp.lt.s32.totalorder %s730_s4, %s2898_s30 }
 0x136   : > { %p2895_p10 = pnand %p2893_p11, %p3837_p9  ;;  %p2901_p1 = scmp.lt.s32.totalorder %s2899_s22, %s2892_s26 }
 0x138   : > { %p2896_p6 = pneg %p2895_p10  ;;  %p2902_p8 = por %p2901_p1, %p2900_p13 }
 0x13a   : > { %p2903_p4 = pnand %p2902_p8, %p2896_p6 }
 0x13c   : > { %2906 = shalt.err (!%p2903_p4)
}
 0x13d   : > { %p3844_p7 = scmp.ne.s32.totalorder %s3826_s20, 0  ;;  %p3845_p0 = scmp.ne.s32.totalorder %s3824_s23, 0 }
 0x13e   : > { %p3846_p5 = scmp.eq.s32.totalorder (!%p3845_p0), %s3112_s0, 0 }
 0x13f   : > { %2433 = dma.hbm_to_vmem [thread:$0]  (!%p3844_p7), %s3462_s17, 16, %s730_s4, %s720_s16  }
 0x140   : > { %738 = sbr.rel (%p3845_p0) target bundleno = 4038 (0xfc6), region = 92 }
 0x147   : > { %2924 = dma.done.wait (%p3846_p5), [#allocation4], 16   ;;  %p3847_p9 = pmov %p3846_p5 }
 0x148   : > { %s744_s25 = sand.u32 1, %s3112_s0   ;;  %s3491_s29 = sand.u32 1, %s2957_s28  }
 0x149   : > { %2926 = vsyncadd (%p3847_p9), [#allocation4], 4294967280  ;;  %s745_s8 = scalar_lea.sflag [#allocation6], %s744_s25  ;;  %s747_s20 = scalar_lea.vmem [#allocation5], %s3491_s29 }
 0x14a   : > { %p3848_p8 = scmp.ne.s32.totalorder %s3823_s2, 0 }
 0x14c   : > { %2928 = dma.done.wait (%p3848_p8), %s745_s8, 32  }
 0x14d   : > { %2930 = vsyncadd (%p3848_p8), %s745_s8, 4294967264  ;;  %s755_s23 = scalar_lea.vmem [#allocation7], %s3491_s29  ;;  %s761_s10 = scalar_lea.sflag [#allocation9], %s744_s25 }
 0x14e   : > { %2932 = dma.done.wait (%p3848_p8), %s761_s10, 32  }
 0x14f   : > { %2934 = vsyncadd (%p3848_p8), %s761_s10, 4294967264  ;;  %s2189_s17 = sshll.u32 %s3491_s29, 4  ;;  %s777_s4 = scalar_lea.sflag [#allocation12], %s744_s25 }
 0x150   : > { %s3506_s16 = scalar_lea.vmem [#allocation11], %s2189_s17 }
 0x151   : > { %2936 = dma.done.wait (%p3848_p8), %s777_s4, 272  }
 0x152   : > { %2938 = vsyncadd (%p3848_p8), %s777_s4, 4294967024  ;;  %s794_s24 = scalar_lea.sflag [#allocation15], %s744_s25 }
 0x153   : > { %2940 = dma.done.wait (%p3848_p8), %s794_s24, 32  }
 0x154   : > { %2942 = vsyncadd (%p3848_p8), %s794_s24, 4294967264  ;;  %s810_s6 = scalar_lea.sflag [#allocation18], %s744_s25 }
 0x155   : > { %2944 = dma.done.wait (%p3848_p8), %s810_s6, 16  }
 0x156   : > { %2946 = vsyncadd (%p3848_p8), %s810_s6, 4294967280  ;;  %p3849_p2 = pmov %p3846_p5 }
 0x158   : > { %2948 = dma.done.wait (%p3849_p2), [#allocation18], 16   ;;  %p3850_p12 = pmov %p3849_p2 }
 0x159   : > { %p911_p3 = scmp.lt.s32.totalorder %s3112_s0, 1  ;;  %s3851_s8 = sld [smem:[#allocation33_spill]] }
 0x15a   : > { %2950 = vsyncadd (%p3850_p12), [#allocation18], 4294967280  ;;  %s3852_s4 = sld [smem:[#allocation35_spill]]  ;;  %s3853_s18 = sld [smem:[#allocation38_spill]] }
 0x15b   : > { %s912_s26 = scalar_select %p911_p3, %s3112_s0, 1 }
 0x15c   : > { %p3854_p11 = scmp.ne.s32.totalorder %s3112_s0, 0 }
 0x15d   : > { %s2249_s1 = sshll.u32 %s912_s26, 4  ;;  %s2251_s30 = sshll.u32 %s912_s26, 5  ;;  %v2980_v1 = vmov (!%p3854_p11), 0   ;;  %vm1016_vm0 = vcmask (!%p3854_p11), 130048   ;;  %v2198_v14 = vld [vmem:[#allocation3] ss:$0 sm:$0xff] (!%p3854_p11) }
 0x15e   : > { %930 = sbr.rel (%p3854_p11) target bundleno = 728 (0x2d8), region = 140  ;;  %s3855_s27 = sld [smem:[#allocation32_spill]] (!%p3854_p11)  ;;  %1020 = vmatprep.subr.bf16.mxu0 (!%p3854_p11), %v2980_v1  ;;  %vm1068_vm1 = vcmask (!%p3854_p11), 1043456   ;;  %vm1070_vm2 = vcmask (!%p3854_p11), 261120   ;;  %vm1072_vm3 = vcmask (!%p3854_p11), 257024  }
 0x15f   : > { %s3533_s10 = scalar_lea.vmem %s3851_s8, %s2249_s1  ;;  %s3857_s8 = sld [smem:[#allocation30_spill]] (!%p3854_p11) }
 0x160   : > { %s3538_s24 = scalar_lea.vmem %s3852_s4, %s2249_s1  ;;  %s3543_s5 = scalar_lea.vmem %s3853_s18, %s2251_s30 }
 0x161   : > { %s2981_s30 = smov (!%p3854_p11), 96  }
 0x164   : > { %s3856_s21 = smov (!%p3854_p11), %s3855_s27  ;;  %v2493_v0 = vld [vmem:[%s3855_s27] sm:$0xff] (!%p3854_p11)  }
 0x165   : > { %1021 = vmatpush1.bf16.msra.mxu0 %v2493_v0  ;;  %v2494_v2 = vld [vmem:[%s3856_s21 + $0x8] sm:$0xff]   ;;  %v2495_v3 = vld [vmem:[%s3856_s21 + $0x10] sm:$0xff]   ;;  %v931_v4 = vld [vmem:[%s3857_s8] sm:$0xff]  ;;  %s2982_s8 = smov 64  }
 0x166   : > { %1022 = vmatprep.subr.bf16.mxu0 %v2980_v1  ;;  %v2496_v5 = vld [vmem:[%s3856_s21 + $0x18] sm:$0xff]   ;;  %v951_v6 = vcombine.high %v931_v4, %v931_v4  ;;  %v2497_v8 = vld [vmem:[%s3856_s21 + $0x20] sm:$0xff]   ;;  %v2498_v9 = vld [vmem:[%s3856_s21 + $0x28] sm:$0xff]   ;;  %v953_v13 = vpack.c.bf16 %v931_v4, %v931_v4 }
 0x167   : > { %v2499_v10 = vld [vmem:[%s3856_s21 + $0x30] sm:$0xff]   ;;  %v2500_v11 = vld [vmem:[%s3856_s21 + $0x38] sm:$0xff]   ;;  %v2501_v12 = vld [vmem:[%s3856_s21 + $0x40] sm:$0xff]  }
 0x168   : > { %v954_v7 = vpack.c.bf16 %v951_v6, %v951_v6 }
 0x169   : > { %1023 = vmatpush1.bf16.msra.mxu0 %v2494_v2 }
 0x16a   : > { %1024 = vmatprep.subr.bf16.mxu0 %v2980_v1  ;;  %2208 = vmatprep.mubr.msk.bf16.mxu0 %vm1016_vm0, %v954_v7 }
 0x16d   : > { %1025 = vmatpush1.bf16.msra.mxu0 %v2495_v3 }
 0x16e   : > { %1026 = vmatprep.subr.bf16.mxu0 %v2980_v1 }
 0x171   : > { %1027 = vmatpush1.bf16.msra.mxu0 %v2496_v5 }
 0x172   : > { %1028 = vmatprep.subr.bf16.mxu0 %v2980_v1 }
 0x175   : > { %1029 = vmatpush1.bf16.msra.mxu0 %v2497_v8 }
 0x176   : > { %1030 = vmatprep.subr.bf16.mxu0 %v2980_v1 }
 0x179   : > { %1031 = vmatpush1.bf16.msra.mxu0 %v2498_v9 }
 0x17a   : > { %1032 = vmatprep.subr.bf16.mxu0 %v2980_v1 }
 0x17d   : > { %1033 = vmatpush1.bf16.msra.mxu0 %v2499_v10 }
 0x17e   : > { %1034 = vmatprep.subr.bf16.mxu0 %v2980_v1 }
 0x181   : > { %1035 = vmatpush1.bf16.msra.mxu0 %v2500_v11 }
 0x182   : > { %1036 = vmatprep.subr.bf16.mxu0 %v2980_v1 }
 0x185   : > { %1037 = vmatpush1.bf16.msra.mxu0 %v2501_v12 }
 0x188   : > { %1053 = vmatmul.mubr.bf16.vlgmr.msra.gmra.mrb[0].mxu0 %v953_v13 }
 0x25b   : > { %v1054_v15 = vpop.f32.mrb[0].mxu0 }
 0x25c   : > { %v1055_v16 = vadd.f32 %v2198_v14, %v1054_v15  ;;  %v1056_v17 = vpop.f32.mrb[1].mxu0 }
 0x25d   : > { %v1057_v18 = vpop.f32.mrb[2].mxu0 }
 0x25e   : > { %v1058_v19 = vpop.f32.mrb[3].mxu0  ;;  %v1061_v20 = vrot.slane %v1055_v16, 4 }
 0x260   : > { %1062 = vrot.lane.b32.xlu0 %v1061_v20, %s2981_s30 }
 0x264   : > { %1065 = vrot.lane.b32.xlu0 %v1055_v16, %s2982_s8 }
 0x2d2   : > { %v1063_v21 = vpop.permute.xlu0 %1062 }
 0x2d3   : > { %v1069_v22 = vsel %vm1068_vm1, %v1055_v16, %v1063_v21 }
 0x2d4   : > { %1071 = vst.msk [vmem:[#allocation2] sm:$0xff] %vm1070_vm2, %v1069_v22 }
 0x2d6   : > { %v1066_v23 = vpop.permute.xlu0 %1065 }
 0x2d7   : > { %1073 = vst.msk [vmem:[#allocation2 + $0x8] sm:$0xf] %vm1072_vm3, %v1066_v23 }
 0x2d8 PF: > { %v2523_v24 = vld [vmem:[%s3533_s10] sm:$0xff]   ;;  %v2983_v25 = vmov 0.0   ;;  %v2524_v26 = vld [vmem:[%s3533_s10 + $0x8] sm:$0xff]   ;;  %vm2984_vm4 = vmmov 0   ;;  %vm1100_vm5 = vcmask 261120   ;;  %s2985_s10 = smov 112  }
 0x2d9   : > { %2285 = vmatprep.subr.bf16.mxu1 %v2983_v25  ;;  %2311 = vmatprep.subr.bf16.mxu0 %v2983_v25  ;;  %v2209_v30 = vld [vmem:[%s747_s20] ss:$0 sm:$0xff]  ;;  %vm1147_vm6 = vcmask 1043456   ;;  %s2986_s27 = smov 120   ;;  %s2987_s12 = smov 104   ;;  %vm1189_vm7 = vcmask 64512  }
 0x2da   : > { %2286 = vmatpush3.bf16.msra.mxu1 %v2523_v24  ;;  %2289 = vmatprep.mubr.msk.bf16.mxu1 %vm2984_vm4, %v2983_v25  ;;  %s2988_s20 = smov 96   ;;  %s3858_s4 = sld [smem:[#allocation31_spill]]  ;;  %vm1265_vm8 = vcmask 392192   ;;  %vm1441_vm9 = vcmask 130048   ;;  %vm1444_vm10 = vcmask 195584   ;;  %vm1522_vm11 = vcmask 257024  }
 0x2db   : > { %v3583_v27 = vld [vmem:[#allocation2] sm:$0xff]  ;;  %2287 = vmatprep.subr.bf16.mxu1 %v2983_v25  ;;  %2317 = vmatprep.mubr.msk.bf16.mxu0 %vm2984_vm4, %v2983_v25  ;;  %s3861_s17 = scalar_lea.vmem [#allocation13], %s3491_s29  ;;  %vm1689_vm12 = vcmask 523264   ;;  %s3863_s2 = scalar_lea.vmem [#allocation16], %s3491_s29 }
 0x2dc   : > { %s3864_s6 = scalar_lea.vmem [#allocation17], %s3491_s29  ;;  %p2237_p10 = scmp.ne.s32.totalorder %s3112_s0, 1 }
 0x2dd   : > { %s3865_s25 = sld [smem:[#allocation39_spill]] (!%p2237_p10)  ;;  %vm2995_vm13 = vmmov (!%p2237_p10), 0   ;;  %s2996_s18 = smov (!%p2237_p10), 64   ;;  %vm1853_vm14 = vcmask (!%p2237_p10), 785408  }
 0x2de   : > { %v3585_v28 = vld [vmem:[#allocation2 + $0x8] sm:$0xf]  ;;  %2288 = vmatpush3.bf16.msra.mxu1 %v2524_v26 }
 0x2df   : > { %v1080_v29 = vpack.c.bf16 %v3585_v28, %v3583_v27  ;;  %2293 = vmatprep.subr.bf16.mxu1 %v2983_v25 }
 0x2e0   : > { %v1174_v59 = vld [vmem:[%s3858_s4] sm:$0xff]  ;;  %v1175_v61 = vld [vmem:[%s3858_s4 + $0x8] sm:$0xff]  ;;  %v1176_v5 = vld [vmem:[%s3858_s4 + $0x10] sm:$0xff] }
 0x2e1   : > { %2290 = vmatmul.mubr.msk.bf16.vlgmr.msra.gmra.mrb[0].mxu1 %vm1100_vm5, %v1080_v29  ;;  %v1177_v7 = vld [vmem:[%s3858_s4 + $0x18] sm:$0xff]  ;;  %v1178_v14 = vld [vmem:[%s3858_s4 + $0x20] sm:$0xff]  ;;  %v1179_v17 = vld [vmem:[%s3858_s4 + $0x28] sm:$0xff] }
 0x2e2   : > { %2299 = vmatprep.mubr.msk.bf16.mxu1 %vm2984_vm4, %v2983_v25 }
 0x3b4   : > { %v1138_v31 = vpop.f32.mrb[0].mxu1 }
 0x3b5   : > { %v1139_v32 = vadd.f32 %v2209_v30, %v1138_v31  ;;  %v2291_v33 = vpop.f32.mrb[1].mxu1 }
 0x3b6   : > { %v1141_v34 = vpop.f32.mrb[2].mxu1 }
 0x3b7   : > { %v1142_v35 = vadd.f32 %v2209_v30, %v1141_v34  ;;  %1157 = vrot.lane.b32.xlu1 %v1139_v32, %s2985_s10  ;;  %v2292_v36 = vpop.f32.mrb[3].mxu1  ;;  %v1148_v37 = vrot.slane %v1139_v32, 4 }
 0x3b9   : > { %v1149_v38 = vrot.slane %v1142_v35, 4  ;;  %1151 = vrot.lane.b32.xlu0 %v1148_v37, %s2986_s27 }
 0x3bb   : > { %1159 = vrot.lane.b32.xlu1 %v1142_v35, %s2985_s10  ;;  %v1150_v39 = vsel %vm1147_vm6, %v1148_v37, %v1149_v38 }
 0x3bc   : > { %v2503_v40 = vpack.i.bf16 %v1150_v39, %v1148_v37 }
 0x3bd   : > { %1153 = vrot.lane.b32.xlu0 %v1150_v39, %s2986_s27  ;;  %s2989_s27 = smov 64  }
 0x3c1   : > { %2504 = vrot.lane.b32.xlu0 %v2503_v40, %s2987_s12  ;;  %s2990_s12 = smov 8  }
 0x429   : > { %v1158_v44 = vpop.permute.xlu1 %1157 }
 0x42b   : > { %v1152_v41 = vpop.permute.xlu0 %1151 }
 0x42c   : > { %v1169_v42 = vsel %vm1147_vm6, %v1142_v35, %v1152_v41 }
 0x42d   : > { %v3600_v43 = vpack.c.bf16 %v1169_v42, %v1139_v32  ;;  %v1160_v50 = vpop.permute.xlu1 %1159 }
 0x42f   : > { %1183 = vrot.lane.b32.xlu1 %v3600_v43, %s2988_s20  ;;  %v1154_v45 = vpop.permute.xlu0 %1153 }
 0x430   : > { %v3603_v46 = vpack.c.bf16 %v1158_v44, %v1154_v45 }
 0x432   : > { %1185 = vrot.lane.b32.xlu0 %v3603_v46, %s2988_s20 }
 0x433   : > { %v2505_v47 = vpop.permute.xlu0 %2504 }
 0x434   : > { %v2507_v48 = vunpack.i.h.bf16 %v2505_v47  ;;  %v2506_v49 = vunpack.i.l.bf16 %v2505_v47 }
 0x436   : > { %v1170_v51 = vsel %vm1147_vm6, %v1160_v50, %v2506_v49 }
 0x437   : > { %v3607_v52 = vpack.c.bf16 %v2507_v48, %v1170_v51 }
 0x439   : > { %1187 = vrot.lane.b32.xlu1 %v3607_v52, %s2988_s20  ;;  %s2992_s20 = smov 24  }
 0x4a1   : > { %v1184_v53 = vpop.permute.xlu1 %1183 }
 0x4a2   : > { %v1200_v54 = vsel %vm1189_vm7, %v1184_v53, 0 }
 0x4a3   : > { %2294 = vmatpush3.bf16.xpose.msra.mxu1 %v1200_v54 }
 0x4a4   : > { %2295 = vmatprep.subr.bf16.mxu1 %v2983_v25  ;;  %v1186_v55 = vpop.permute.xlu0 %1185 }
 0x4a5   : > { %v1203_v56 = vsel %vm1189_vm7, %v1186_v55, 0 }
 0x4ab   : > { %2296 = vmatpush3.bf16.xpose.msra.mxu1 %v1203_v56  ;;  %v1188_v57 = vpop.permute.xlu1 %1187 }
 0x4ac   : > { %2297 = vmatprep.subr.bf16.mxu1 %v2983_v25  ;;  %v1206_v58 = vsel %vm1189_vm7, %v1188_v57, 0 }
 0x4b3   : > { %2298 = vmatpush3.bf16.xpose.msra.mxu1 %v1206_v58 }
 0x4b4   : > { %2337 = vmatprep.subr.bf16.mxu1 %v2983_v25 }
 0x4ba   : > { %2300 = vmatmul.mubr.msk.bf16.vlgmr.msra.gmra.mrb[4].mxu1 %vm1189_vm7, %v3600_v43 }
 0x4bb   : > { %2303 = vmatprep.mubr.msk.bf16.mxu1 %vm2984_vm4, %v2983_v25 }
 0x4c2   : > { %2304 = vmatmul.mubr.msk.bf16.gmra.mrb[8].mxu1 %vm1189_vm7, %v3603_v46 }
 0x4c3   : > { %2307 = vmatprep.mubr.msk.bf16.mxu1 %vm2984_vm4, %v2983_v25 }
 0x4ca   : > { %2308 = vmatmul.mubr.msk.bf16.gmra.mrb[12].mxu1 %vm1189_vm7, %v3607_v52 }
 0x4cb   : > { %2341 = vmatprep.mubr.msk.bf16.mxu1 %vm2984_vm4, %v2983_v25 }
 0x58d   : > { %v1242_v60 = vpop.f32.mrb[4].mxu1 }
 0x58e   : > { %v1243_v62 = vadd.f32 %v1242_v60, %v1174_v59  ;;  %v2301_v63 = vpop.f32.mrb[5].mxu1 }
 0x58f   : > { %v1245_v0 = vpop.f32.mrb[6].mxu1 }
 0x590   : > { %v1246_v1 = vadd.f32 %v1245_v0, %v1175_v61  ;;  %v2302_v2 = vpop.f32.mrb[7].mxu1  ;;  %v1266_v3 = vsel %vm1265_vm8, %v1243_v62, -inf }
 0x591   : > { %1267 = vmax.xlane.f32.xlu0 %v1266_v3 }
 0x592   : > { %v1269_v4 = vsel %vm1265_vm8, %v1246_v1, -inf }
 0x593   : > { %1270 = vmax.xlane.f32.xlu1 %v1269_v4 }
 0x595   : > { %v1250_v6 = vpop.f32.mrb[8].mxu1 }
 0x596   : > { %v1251_v8 = vadd.f32 %v1250_v6, %v1176_v5  ;;  %v2305_v9 = vpop.f32.mrb[9].mxu1 }
 0x597   : > { %v1253_v10 = vpop.f32.mrb[10].mxu1 }
 0x598   : > { %v1254_v11 = vadd.f32 %v1253_v10, %v1177_v7  ;;  %v2306_v12 = vpop.f32.mrb[11].mxu1  ;;  %v1272_v13 = vsel %vm1265_vm8, %v1251_v8, -inf }
 0x599   : > { %1273 = vmax.xlane.f32.xlu0 %v1272_v13 }
 0x59a   : > { %v1275_v15 = vsel %vm1265_vm8, %v1254_v11, -inf }
 0x59d   : > { %1276 = vmax.xlane.f32.xlu0 %v1275_v15  ;;  %v1258_v16 = vpop.f32.mrb[12].mxu1 }
 0x59e   : > { %v1259_v18 = vadd.f32 %v1258_v16, %v1178_v14  ;;  %v2309_v19 = vpop.f32.mrb[13].mxu1 }
 0x59f   : > { %v1261_v20 = vpop.f32.mrb[14].mxu1 }
 0x5a0   : > { %v1262_v21 = vadd.f32 %v1261_v20, %v1179_v17  ;;  %v2310_v22 = vpop.f32.mrb[15].mxu1  ;;  %v1278_v23 = vsel %vm1265_vm8, %v1259_v18, -inf }
 0x5a1   : > { %1279 = vmax.xlane.f32.xlu1 %v1278_v23  ;;  %v2526_v23 = vld [vmem:[%s3538_s24 + $0x8] sm:$0xff]  }
 0x5a2   : > { %v1281_v24 = vsel %vm1265_vm8, %v1262_v21, -inf }
 0x5a3   : > { %1282 = vmax.xlane.f32.xlu0 %v1281_v24 }
 0x5b2   : > { %1335 = vrot.lane.b32.xlu1 %v3600_v43, %s2989_s27 }
 0x61e   : > { %v1268_v26 = vpop.xlane.xlu0 %1267 }
 0x61f   : > { %v1284_v29 = vsub.f32 %v1243_v62, %v1268_v26 }
 0x620   : > { %v1271_v30 = vpop.xlane.xlu1 %1270 }
 0x621   : > { %v1290_v31 = vmul.f32 1.442695, %v1284_v29  ;;  %v1285_v32 = vsub.f32 %v1246_v1, %v1271_v30 }
 0x623   : > { %2533 = vpow2.f32 %v1290_v31  ;;  %v1292_v33 = vmul.f32 1.442695, %v1285_v32 }
 0x625   : > { %2535 = vpow2.f32 %v1292_v33 }
 0x626   : > { %v1274_v34 = vpop.xlane.xlu0 %1273 }
 0x627   : > { %v1286_v35 = vsub.f32 %v1251_v8, %v1274_v34 }
 0x629   : > { %v1294_v36 = vmul.f32 1.442695, %v1286_v35 }
 0x62a   : > { %v1277_v37 = vpop.xlane.xlu0 %1276 }
 0x62b   : > { %2537 = vpow2.f32 %v1294_v36  ;;  %v1287_v38 = vsub.f32 %v1254_v11, %v1277_v37 }
 0x62d   : > { %v2534_v39 = vpop.eup %2533  ;;  %v1296_v40 = vmul.f32 1.442695, %v1287_v38 }
 0x62e   : > { %v1280_v41 = vpop.xlane.xlu1 %1279  ;;  %v1302_v42 = vsel %vm1265_vm8, %v2534_v39, 0.0 }
 0x62f   : > { %v2536_v43 = vpop.eup %2535  ;;  %2539 = vpow2.f32 %v1296_v40  ;;  %v1288_v44 = vsub.f32 %v1259_v18, %v1280_v41  ;;  %1303 = vadd.xlane.f32.xlu1 %v1302_v42  ;;  %v2525_v18 = vld [vmem:[%s3538_s24] sm:$0xff]   ;;  %s2991_s24 = smov 16  }
 0x630   : > { %v1283_v45 = vpop.xlane.xlu0 %1282  ;;  %v1305_v47 = vsel %vm1265_vm8, %v2536_v43, 0.0 }
 0x631   : > { %v1298_v48 = vmul.f32 1.442695, %v1288_v44  ;;  %v1289_v49 = vsub.f32 %v1262_v21, %v1283_v45  ;;  %1306 = vadd.xlane.f32.xlu0 %v1305_v47 }
 0x632   : > { %v1336_v50 = vpop.permute.xlu1 %1335 }
 0x633   : > { %2541 = vpow2.f32 %v1298_v48  ;;  %v1300_v51 = vmul.f32 1.442695, %v1289_v49  ;;  %2312 = vmatpush3.bf16.msra.mxu0 %v1336_v50 }
 0x634   : > { %2313 = vmatprep.subr.bf16.mxu0 %v2983_v25 }
 0x635   : > { %v2538_v53 = vpop.eup %2537  ;;  %2543 = vpow2.f32 %v1300_v51 }
 0x636   : > { %v1308_v54 = vsel %vm1265_vm8, %v2538_v53, 0.0 }
 0x637   : > { %1309 = vadd.xlane.f32.xlu1 %v1308_v54 }
 0x639   : > { %v2540_v55 = vpop.eup %2539 }
 0x63a   : > { %v1311_v56 = vsel %vm1265_vm8, %v2540_v55, 0.0 }
 0x63b   : > { %1312 = vadd.xlane.f32.xlu0 %v1311_v56 }
 0x63d   : > { %v2542_v57 = vpop.eup %2541 }
 0x63e   : > { %v1314_v58 = vsel %vm1265_vm8, %v2542_v57, 0.0 }
 0x63f   : > { %v2544_v59 = vpop.eup %2543  ;;  %1315 = vadd.xlane.f32.xlu1 %v1314_v58 }
 0x640   : > { %v1317_v60 = vsel %vm1265_vm8, %v2544_v59, 0.0 }
 0x641   : > { %1318 = vadd.xlane.f32.xlu0 %v1317_v60 }
 0x650   : > { %1339 = vrot.lane.b32.xlu1 %v3607_v52, %s2989_s27 }
 0x657   : > { %1337 = vrot.lane.b32.xlu0 %v3603_v46, %s2989_s27 }
 0x6bc   : > { %v1304_v62 = vpop.xlane.xlu1 %1303 }
 0x6be   : > { %v1307_v61 = vpop.xlane.xlu0 %1306 }
 0x6bf   : > { %2545 = vrcp.f32 %v1307_v61 }
 0x6c0   : > { %2547 = vrcp.f32 %v1304_v62  ;;  %v2219_v62 = vld [vmem:[%s755_s23] ss:$0 sm:$0xff]  ;;  %s3859_s23 = scalar_lea.vmem [#allocation8], %s3491_s29 }
 0x6c4   : > { %v1310_v0 = vpop.xlane.xlu1 %1309 }
 0x6c8   : > { %v1313_v63 = vpop.xlane.xlu0 %1312 }
 0x6c9   : > { %2549 = vrcp.f32 %v1313_v63  ;;  %v2546_v3 = vpop.eup %2545 }
 0x6ca   : > { %2551 = vrcp.f32 %v1310_v0  ;;  %v2548_v5 = vpop.eup %2547  ;;  %v1327_v52 = vmul.f32 %v2546_v3, %v2536_v43 }
 0x6cb   : > { %v1326_v7 = vmul.f32 %v2548_v5, %v2534_v39 }
 0x6cc   : > { %v1316_v2 = vpop.xlane.xlu1 %1315 }
 0x6cd   : > { %v1332_v46 = vpack.c.bf16 %v1327_v52, %v1326_v7 }
 0x6ce   : > { %v1319_v1 = vpop.xlane.xlu0 %1318 }
 0x6cf   : > { %2553 = vrcp.f32 %v1319_v1 }
 0x6d0   : > { %v1340_v6 = vpop.permute.xlu1 %1339  ;;  %2555 = vrcp.f32 %v1316_v2 }
 0x6d2   : > { %v1338_v4 = vpop.permute.xlu0 %1337 }
 0x6d3   : > { %2314 = vmatpush3.bf16.msra.mxu0 %v1338_v4  ;;  %v2550_v8 = vpop.eup %2549 }
 0x6d4   : > { %2315 = vmatprep.subr.bf16.mxu0 %v2983_v25  ;;  %v2552_v9 = vpop.eup %2551  ;;  %v1329_v10 = vmul.f32 %v2550_v8, %v2540_v55 }
 0x6d5   : > { %v1328_v11 = vmul.f32 %v2552_v9, %v2538_v53 }
 0x6d7   : > { %2316 = vmatpush3.bf16.msra.mxu0 %v1340_v6  ;;  %v1333_v12 = vpack.c.bf16 %v1329_v10, %v1328_v11 }
 0x6d8   : > { %2329 = vmatprep.subr.bf16.mxu0 %v2983_v25 }
 0x6d9   : > { %v2554_v13 = vpop.eup %2553 }
 0x6da   : > { %2318 = vmatmul.mubr.msk.bf16.vlgmr.msra.gmra.mrb[0].mxu0 %vm1265_vm8, %v1332_v46  ;;  %v2556_v14 = vpop.eup %2555  ;;  %v1331_v15 = vmul.f32 %v2554_v13, %v2544_v59 }
 0x6db   : > { %2321 = vmatprep.mubr.msk.bf16.mxu0 %vm2984_vm4, %v2983_v25  ;;  %v1330_v16 = vmul.f32 %v2556_v14, %v2542_v57  ;;  %2330 = vmatpush3.bf16.msra.mxu0 %v2525_v18 }
 0x6dc   : > { %2331 = vmatprep.subr.bf16.mxu0 %v2983_v25 }
 0x6dd   : > { %v1334_v17 = vpack.c.bf16 %v1331_v15, %v1330_v16  ;;  %v2528_v16 = vld [vmem:[%s3506_s16 + $0x8] sm:$0xff]  }
 0x6df   : > { %2332 = vmatpush3.bf16.msra.mxu0 %v2526_v23 }
 0x6e0   : > { %2345 = vmatprep.subr.bf16.mxu0 %v2983_v25 }
 0x6e2   : > { %2322 = vmatmul.mubr.msk.bf16.gmra.mrb[4].mxu0 %vm1265_vm8, %v1333_v12 }
 0x6e3   : > { %2325 = vmatprep.mubr.msk.bf16.mxu0 %vm2984_vm4, %v2983_v25 }
 0x6ea   : > { %2326 = vmatmul.mubr.msk.bf16.gmra.mrb[8].mxu0 %vm1265_vm8, %v1334_v17 }
 0x6eb   : > { %2333 = vmatprep.mubr.msk.bf16.mxu0 %vm2984_vm4, %v2983_v25 }
 0x7ad   : > { %v1387_v19 = vpop.f32.mrb[0].mxu0 }
 0x7ae   : > { %v2319_v20 = vpop.f32.mrb[1].mxu0 }
 0x7af   : > { %v1390_v21 = vpop.f32.mrb[2].mxu0 }
 0x7b0   : > { %v2320_v22 = vpop.f32.mrb[3].mxu0  ;;  %v1412_v26 = vrot.slane %v1390_v21, 4 }
 0x7b5   : > { %v1395_v24 = vpop.f32.mrb[4].mxu0 }
 0x7b6   : > { %v1413_v29 = vrot.slane %v1395_v24, 4  ;;  %v2323_v30 = vpop.f32.mrb[5].mxu0 }
 0x7b7   : > { %v1398_v31 = vpop.f32.mrb[6].mxu0 }
 0x7b8   : > { %v1414_v32 = vsel %vm1147_vm6, %v1412_v26, %v1413_v29  ;;  %v2324_v33 = vpop.f32.mrb[7].mxu0  ;;  %v2223_v26 = vld [vmem:[%s3859_s23] ss:$0 sm:$0xff]  ;;  %s2997_s23 = smov (!%p2237_p10), 96  }
 0x7b9   : > { %v2508_v34 = vpack.i.bf16 %v1413_v29, %v1414_v32 }
 0x7bb   : > { %2509 = vrot.lane.b32.xlu1 %v2508_v34, %s2990_s12 }
 0x7bd   : > { %v1403_v35 = vpop.f32.mrb[8].mxu0 }
 0x7be   : > { %v2513_v36 = vpack.i.bf16 %v1403_v35, %v1398_v31  ;;  %v2327_v37 = vpop.f32.mrb[9].mxu0  ;;  %v1430_v39 = vrot.slane %v1403_v35, 4 }
 0x7bf   : > { %v1406_v38 = vpop.f32.mrb[10].mxu0  ;;  %v2529_v37 = vld [vmem:[%s3543_s5] sm:$0xff]  }
 0x7c0   : > { %v1431_v40 = vrot.slane %v1406_v38, 4  ;;  %2514 = vrot.lane.b32.xlu0 %v2513_v36, %s2991_s24  ;;  %v2328_v41 = vpop.f32.mrb[11].mxu0  ;;  %v2530_v38 = vld [vmem:[%s3543_s5 + $0x8] sm:$0xff]  }
 0x7c1   : > { %v2225_v41 = vld [vmem:[%s3861_s17] ss:$0 sm:$0xff] }
 0x7c2   : > { %v1432_v42 = vsel %vm1147_vm6, %v1430_v39, %v1431_v40  ;;  %v2531_v39 = vld [vmem:[%s3543_s5 + $0x10] sm:$0xff]  }
 0x7c3   : > { %v2518_v43 = vpack.i.bf16 %v1431_v40, %v1432_v42  ;;  %v2532_v40 = vld [vmem:[%s3543_s5 + $0x18] sm:$0xff]   ;;  %s3862_s5 = scalar_lea.vmem [#allocation14], %s3491_s29 }
 0x7c5   : > { %2519 = vrot.lane.b32.xlu1 %v2518_v43, %s2992_s20 }
 0x82d   : > { %v2510_v44 = vpop.permute.xlu1 %2509 }
 0x82e   : > { %v2512_v47 = vunpack.i.h.bf16 %v2510_v44  ;;  %v2511_v48 = vunpack.i.l.bf16 %v2510_v44 }
 0x830   : > { %v1440_v53 = vsel %vm1189_vm7, %v1390_v21, %v2512_v47  ;;  %v1439_v54 = vsel %vm1189_vm7, %v1387_v19, %v2511_v48 }
 0x832   : > { %v2515_v45 = vpop.permute.xlu0 %2514 }
 0x833   : > { %v2517_v49 = vunpack.i.h.bf16 %v2515_v45  ;;  %v2516_v50 = vunpack.i.l.bf16 %v2515_v45 }
 0x835   : > { %v1443_v57 = vsel %vm1441_vm9, %v1440_v53, %v2517_v49  ;;  %v1442_v58 = vsel %vm1441_vm9, %v1439_v54, %v2516_v50 }
 0x837   : > { %v2520_v51 = vpop.permute.xlu1 %2519 }
 0x838   : > { %v2522_v55 = vunpack.i.h.bf16 %v2520_v51  ;;  %v2521_v56 = vunpack.i.l.bf16 %v2520_v51 }
 0x83a   : > { %v1446_v59 = vsel %vm1444_vm10, %v1443_v57, %v2522_v55  ;;  %v1445_v60 = vsel %vm1444_vm10, %v1442_v58, %v2521_v56 }
 0x83b   : > { %v1451_v61 = vpack.c.bf16 %v1446_v59, %v1445_v60 }
 0x83d   : > { %2334 = vmatmul.mubr.msk.bf16.vlgmr.msra.gmra.mrb[12].mxu0 %vm1100_vm5, %v1451_v61 }
 0x83e   : > { %2353 = vmatprep.mubr.msk.bf16.mxu0 %vm2984_vm4, %v2983_v25  ;;  %2346 = vmatpush3.bf16.msra.mxu0 %v2529_v37 }
 0x83f   : > { %2347 = vmatprep.subr.bf16.mxu0 %v2983_v25 }
 0x842   : > { %2348 = vmatpush3.bf16.msra.mxu0 %v2530_v38 }
 0x843   : > { %2349 = vmatprep.subr.bf16.mxu0 %v2983_v25 }
 0x846   : > { %2350 = vmatpush3.bf16.msra.mxu0 %v2531_v39 }
 0x847   : > { %2351 = vmatprep.subr.bf16.mxu0 %v2983_v25 }
 0x84a   : > { %2352 = vmatpush3.bf16.msra.mxu0 %v2532_v40 }
 0x910   : > { %v1508_v63 = vpop.f32.mrb[12].mxu0 }
 0x911   : > { %v1509_v0 = vadd.f32 %v2219_v62, %v1508_v63  ;;  %v2335_v1 = vpop.f32.mrb[13].mxu0 }
 0x912   : > { %v1511_v2 = vpop.f32.mrb[14].mxu0 }
 0x913   : > { %v1512_v3 = vadd.f32 %v2219_v62, %v1511_v2  ;;  %v2336_v4 = vpop.f32.mrb[15].mxu0  ;;  %v1515_v5 = vadd.f32 %v1509_v0, %v3583_v27 }
 0x914   : > { %v2229_v4 = vld [vmem:[%s3862_s5] ss:$0 sm:$0xff]  ;;  %s3866_s5 = sld [smem:[#allocation41_spill]] (!%p2237_p10) }
 0x915   : > { %v1519_v52 = vsel %vm1100_vm5, %v1515_v5, 0.0  ;;  %v1516_v6 = vadd.f32 %v1512_v3, %v3585_v28  ;;  %v2527_v28 = vld [vmem:[%s3506_s16] sm:$0xff]   ;;  %s3860_s16 = scalar_lea.vmem [#allocation10], %s3491_s29  ;;  %s2994_s29 = smov (!%p2237_p10), 32  }
 0x916   : > { %1520 = vadd.xlane.f32.xlu0 %v1519_v52  ;;  %2338 = vmatpush3.bf16.msra.mxu1 %v2527_v28  ;;  %v2224_v32 = vld [vmem:[%s3860_s16] ss:$0 sm:$0xff] }
 0x917   : > { %v1523_v7 = vsel %vm1522_vm11, %v1516_v6, 0.0  ;;  %2339 = vmatprep.subr.bf16.mxu1 %v2983_v25 }
 0x918   : > { %1524 = vadd.xlane.f32.xlu1 %v1523_v7 }
 0x91a   : > { %2340 = vmatpush3.bf16.msra.mxu1 %v2528_v16 }
 0x9a3   : > { %v1521_v46 = vpop.xlane.xlu0 %1520 }
 0x9a4   : > { %v1527_v8 = vmul.f32 0.03125, %v1521_v46 }
 0x9a5   : > { %v1525_v9 = vpop.xlane.xlu1 %1524 }
 0x9a6   : > { %v1529_v10 = vsub.f32 %v1515_v5, %v1527_v8  ;;  %v1528_v11 = vmul.f32 0.03125, %v1525_v9 }
 0x9a8   : > { %v1530_v12 = vsub.f32 %v1516_v6, %v1528_v11  ;;  %v1531_v13 = vmul.f32 %v1529_v10, %v1529_v10 }
 0x9aa   : > { %v1533_v27 = vsel %vm1100_vm5, %v1531_v13, 0.0  ;;  %v1532_v14 = vmul.f32 %v1530_v12, %v1530_v12 }
 0x9ab   : > { %1534 = vadd.xlane.f32.xlu0 %v1533_v27 }
 0x9ac   : > { %v1536_v15 = vsel %vm1522_vm11, %v1532_v14, 0.0 }
 0x9af   : > { %1537 = vadd.xlane.f32.xlu0 %v1536_v15 }
 0xa38   : > { %v1535_v17 = vpop.xlane.xlu0 %1534 }
 0xa39   : > { %v1539_v18 = vmul.f32 0.03125, %v1535_v17 }
 0xa3b   : > { %v1541_v19 = vadd.f32 1e-05, %v1539_v18 }
 0xa3c   : > { %v1538_v20 = vpop.xlane.xlu0 %1537 }
 0xa3d   : > { %2557 = vrsqrt.f32 %v1541_v19  ;;  %v1540_v21 = vmul.f32 0.03125, %v1538_v20 }
 0xa3f   : > { %v1542_v22 = vadd.f32 1e-05, %v1540_v21 }
 0xa41   : > { %2559 = vrsqrt.f32 %v1542_v22 }
 0xa47   : > { %v2558_v23 = vpop.eup %2557 }
 0xa48   : > { %v1545_v24 = vmul.f32 %v2558_v23, %v1529_v10 }
 0xa4a   : > { %v1553_v30 = vmul.f32 %v2223_v26, %v1545_v24 }
 0xa4b   : > { %v2560_v29 = vpop.eup %2559 }
 0xa4c   : > { %v1546_v31 = vmul.f32 %v2560_v29, %v1530_v12  ;;  %v1561_v34 = vadd.f32 %v2224_v32, %v1553_v30 }
 0xa4e   : > { %v1554_v33 = vmul.f32 %v2223_v26, %v1546_v31  ;;  %v2235_v31 = vld [vmem:[%s3863_s2] ss:$0 sm:$0xff] }
 0xa50   : > { %v1562_v35 = vadd.f32 %v2224_v32, %v1554_v33 }
 0xa52   : > { %v1567_v36 = vpack.c.bf16 %v1562_v35, %v1561_v34 }
 0xa54   : > { %2342 = vmatmul.mubr.msk.bf16.vlgmr.msra.gmra.mrb[16].mxu1 %vm1100_vm5, %v1567_v36 }
 0xb27   : > { %v1624_v42 = vpop.f32.mrb[16].mxu1 }
 0xb28   : > { %v1625_v43 = vadd.f32 %v2225_v41, %v1624_v42  ;;  %v2343_v44 = vpop.f32.mrb[17].mxu1  ;;  %v2569_v42 = vld [vmem:[%s3865_s25] sm:$0xff] (!%p2237_p10)  }
 0xb29   : > { %v1627_v45 = vpop.f32.mrb[18].mxu1  ;;  %v2571_v44 = vld [vmem:[%s3865_s25 + $0x10] sm:$0xff] (!%p2237_p10)  }
 0xb2a   : > { %v1631_v47 = vmul.f32 %v1625_v43, %v1625_v43  ;;  %v1628_v48 = vadd.f32 %v2225_v41, %v1627_v45  ;;  %v2344_v49 = vpop.f32.mrb[19].mxu1  ;;  %v2993_v41 = vmov (!%p2237_p10), 0.0   ;;  %v2572_v45 = vld [vmem:[%s3865_s25 + $0x18] sm:$0xff] (!%p2237_p10)  }
 0xb2b   : > { %2357 = vmatprep.subr.bf16.mxu0 (!%p2237_p10), %v2993_v41 }
 0xb2c   : > { %v1633_v50 = vmul.f32 %v1631_v47, %v1625_v43  ;;  %v1632_v51 = vmul.f32 %v1628_v48, %v1628_v48  ;;  %v2573_v47 = vld [vmem:[%s3865_s25 + $0x20] sm:$0xff] (!%p2237_p10)  }
 0xb2e   : > { %v1635_v53 = vmul.f32 0.044715, %v1633_v50  ;;  %v1634_v54 = vmul.f32 %v1632_v51, %v1628_v48 }
 0xb30   : > { %v1637_v55 = vadd.f32 %v1635_v53, %v1625_v43  ;;  %v1636_v56 = vmul.f32 0.044715, %v1634_v54 }
 0xb32   : > { %v1639_v57 = vmul.f32 0.7978846, %v1637_v55  ;;  %v1638_v25 = vadd.f32 %v1636_v56, %v1628_v48  ;;  %v2238_v55 = vld [vmem:[#allocation19] ss:$0 sm:$0xff] (!%p2237_p10) }
 0xb34   : > { %2561 = vtanh.f32 %v1639_v57  ;;  %v1640_v58 = vmul.f32 0.7978846, %v1638_v25 }
 0xb36   : > { %2563 = vtanh.f32 %v1640_v58 }
 0xb3e   : > { %v2562_v59 = vpop.eup %2561 }
 0xb3f   : > { %v1643_v60 = vadd.f32 1.0, %v2562_v59 }
 0xb40   : > { %v2564_v61 = vpop.eup %2563 }
 0xb41   : > { %v1645_v62 = vmul.f32 0.5, %v1643_v60  ;;  %v1644_v63 = vadd.f32 1.0, %v2564_v61 }
 0xb43   : > { %v1646_v0 = vmul.f32 0.5, %v1644_v63  ;;  %v1647_v1 = vmul.f32 %v1645_v62, %v1625_v43  ;;  %v2570_v43 = vld [vmem:[%s3865_s25 + $0x8] sm:$0xff] (!%p2237_p10)  }
 0xb45   : > { %v1648_v2 = vmul.f32 %v1646_v0, %v1628_v48  ;;  %v2574_v48 = vld [vmem:[%s3865_s25 + $0x28] sm:$0xff] (!%p2237_p10)  }
 0xb47   : > { %v1657_v3 = vpack.c.bf16 %v1648_v2, %v1647_v1 }
 0xb49   : > { %2354 = vmatmul.mubr.msk.bf16.vlgmr.msra.gmra.mrb[16].mxu0 %vm1689_vm12, %v1657_v3 }
 0xb4a   : > { %2369 = vmatprep.mubr.msk.bf16.mxu0 (!%p2237_p10), %vm2995_vm13, %v2993_v41  ;;  %2358 = vmatpush3.bf16.msra.mxu0 (!%p2237_p10), %v2569_v42 }
 0xb4b   : > { %2359 = vmatprep.subr.bf16.mxu0 (!%p2237_p10), %v2993_v41 }
 0xb4e   : > { %2360 = vmatpush3.bf16.msra.mxu0 (!%p2237_p10), %v2570_v43 }
 0xb4f   : > { %2361 = vmatprep.subr.bf16.mxu0 (!%p2237_p10), %v2993_v41 }
 0xb52   : > { %2362 = vmatpush3.bf16.msra.mxu0 (!%p2237_p10), %v2571_v44 }
 0xb53   : > { %2363 = vmatprep.subr.bf16.mxu0 (!%p2237_p10), %v2993_v41 }
 0xb56   : > { %2364 = vmatpush3.bf16.msra.mxu0 (!%p2237_p10), %v2572_v45 }
 0xb57   : > { %2365 = vmatprep.subr.bf16.mxu0 (!%p2237_p10), %v2993_v41 }
 0xb5a   : > { %2366 = vmatpush3.bf16.msra.mxu0 (!%p2237_p10), %v2573_v47 }
 0xb5b   : > { %2367 = vmatprep.subr.bf16.mxu0 (!%p2237_p10), %v2993_v41 }
 0xb5e   : > { %2368 = vmatpush3.bf16.msra.mxu0 (!%p2237_p10), %v2574_v48 }
 0xc1c   : > { %v1727_v5 = vpop.f32.mrb[16].mxu0 }
 0xc1d   : > { %v1728_v52 = vadd.f32 %v2229_v4, %v1727_v5  ;;  %v2355_v6 = vpop.f32.mrb[17].mxu0 }
 0xc1e   : > { %v1730_v7 = vpop.f32.mrb[18].mxu0 }
 0xc1f   : > { %v1731_v46 = vadd.f32 %v2229_v4, %v1730_v7  ;;  %v2356_v8 = vpop.f32.mrb[19].mxu0  ;;  %v1734_v9 = vadd.f32 %v1728_v52, %v1561_v34  ;;  %v2236_v34 = vld [vmem:[%s3864_s6] ss:$0 sm:$0xff] }
 0xc21   : > { %v1738_v10 = vsel %vm1100_vm5, %v1734_v9, 0.0  ;;  %v1735_v11 = vadd.f32 %v1731_v46, %v1562_v35 }
 0xc22   : > { %1739 = vadd.xlane.f32.xlu1 %v1738_v10 }
 0xc23   : > { %v1741_v12 = vsel %vm1522_vm11, %v1735_v11, 0.0 }
 0xc24   : > { %1742 = vadd.xlane.f32.xlu0 %v1741_v12 }
 0xcaf   : > { %v1740_v13 = vpop.xlane.xlu1 %1739 }
 0xcb0   : > { %v1744_v27 = vmul.f32 0.03125, %v1740_v13 }
 0xcb1   : > { %v1743_v14 = vpop.xlane.xlu0 %1742 }
 0xcb2   : > { %v1746_v15 = vsub.f32 %v1734_v9, %v1744_v27  ;;  %v1745_v28 = vmul.f32 0.03125, %v1743_v14 }
 0xcb4   : > { %v1747_v16 = vsub.f32 %v1735_v11, %v1745_v28  ;;  %v1748_v17 = vmul.f32 %v1746_v15, %v1746_v15 }
 0xcb6   : > { %v1750_v18 = vsel %vm1100_vm5, %v1748_v17, 0.0  ;;  %v1749_v19 = vmul.f32 %v1747_v16, %v1747_v16 }
 0xcb7   : > { %1751 = vadd.xlane.f32.xlu1 %v1750_v18 }
 0xcb8   : > { %v1753_v20 = vsel %vm1522_vm11, %v1749_v19, 0.0 }
 0xcb9   : > { %1754 = vadd.xlane.f32.xlu0 %v1753_v20 }
 0xd44   : > { %v1752_v21 = vpop.xlane.xlu1 %1751 }
 0xd45   : > { %v1756_v22 = vmul.f32 0.03125, %v1752_v21 }
 0xd46   : > { %v1755_v23 = vpop.xlane.xlu0 %1754 }
 0xd47   : > { %v1758_v24 = vadd.f32 1e-05, %v1756_v22  ;;  %v1757_v26 = vmul.f32 0.03125, %v1755_v23 }
 0xd49   : > { %2565 = vrsqrt.f32 %v1758_v24  ;;  %v1759_v29 = vadd.f32 1e-05, %v1757_v26 }
 0xd4b   : > { %2567 = vrsqrt.f32 %v1759_v29 }
 0xd53   : > { %v2566_v30 = vpop.eup %2565 }
 0xd54   : > { %v1762_v32 = vmul.f32 %v2566_v30, %v1746_v15 }
 0xd55   : > { %v2568_v33 = vpop.eup %2567 }
 0xd56   : > { %v1770_v35 = vmul.f32 %v2235_v31, %v1762_v32  ;;  %v1763_v36 = vmul.f32 %v2568_v33, %v1747_v16  ;;  %1785 = sbr.rel (%p2237_p10) target bundleno = 4038 (0xfc6), region = 144 }
 0xd58   : > { %v1778_v37 = vadd.f32 %v2236_v34, %v1770_v35  ;;  %v1771_v38 = vmul.f32 %v2235_v31, %v1763_v36 }
 0xd5a   : > { %1780 = vst.msk [vmem:[#allocation2] sm:$0xff] %vm1100_vm5, %v1778_v37  ;;  %v1779_v39 = vadd.f32 %v2236_v34, %v1771_v38  ;;  %v1787_v40 = vrot.slane (!%p2237_p10), %v1778_v37, 4 }
 0xd5c   : > { %1781 = vst.msk [vmem:[#allocation2 + $0x8] sm:$0xf] %vm1522_vm11, %v1779_v39  ;;  %1788 = vrot.lane.b32.xlu0 (!%p2237_p10), %v1787_v40, %s2994_s29 }
 0xd60   : > { %1792 = vrot.lane.b32.xlu0 %v1779_v39, %s2996_s18 }
 0xdce   : > { %v1789_v49 = vpop.permute.xlu0 %1788 }
 0xdcf   : > { %v1795_v50 = vsel %vm1100_vm5, %v1778_v37, %v1789_v49 }
 0xdd2   : > { %v1793_v51 = vpop.permute.xlu0 %1792 }
 0xdd3   : > { %v1796_v53 = vsel %vm1689_vm12, %v1795_v50, %v1793_v51 }
 0xdd4   : > { %v1809_v54 = vpack.c.bf16 %v1796_v53, %v1796_v53 }
 0xdd6   : > { %2370 = vmatmul.mubr.msk.bf16.vlgmr.msra.gmra.mrb[0].mxu0 %vm1853_vm14, %v1809_v54 }
 0xea9   : > { %v1891_v56 = vpop.f32.mrb[0].mxu0 }
 0xeaa   : > { %v1892_v57 = vadd.f32 %v2238_v55, %v1891_v56  ;;  %v2371_v25 = vpop.f32.mrb[1].mxu0 }
 0xeab   : > { %v1894_v58 = vpop.f32.mrb[2].mxu0 }
 0xeac   : > { %v2372_v59 = vpop.f32.mrb[3].mxu0  ;;  %v1897_v60 = vmul.f32 %v1892_v57, %v1892_v57 }
 0xeae   : > { %1905 = vrot.lane.b32.xlu1 %v1897_v60, %s2997_s23  ;;  %v1898_v61 = vsel %vm1522_vm11, %v1897_v60, 0.0 }
 0xeaf   : > { %1899 = vadd.xlane.f32.xlu0 %v1898_v61 }
 0xeb2   : > { %1914 = vrot.lane.b32.xlu1 %v1897_v60, %s2996_s18 }
 0xf20   : > { %v1906_v62 = vpop.permute.xlu1 %1905 }
 0xf21   : > { %v1908_v63 = vsel %vm1522_vm11, %v1906_v62, 0.0 }
 0xf22   : > { %1909 = vadd.xlane.f32.xlu1 %v1908_v63 }
 0xf24   : > { %v1915_v0 = vpop.permute.xlu1 %1914 }
 0xf25   : > { %v1917_v1 = vsel %vm1522_vm11, %v1915_v0, 0.0 }
 0xf26   : > { %1918 = vadd.xlane.f32.xlu0 %v1917_v1 }
 0xf3c   : > { %v1900_v2 = vpop.xlane.xlu0 %1899 }
 0xf3d   : > { %v1901_v3 = vmax.f32 %v1900_v2, 1e-24 }
 0xfaf   : > { %v1910_v4 = vpop.xlane.xlu1 %1909 }
 0xfb0   : > { %v1911_v5 = vmax.f32 %v1910_v4, 1e-24 }
 0xfb2   : > { %2575 = vrsqrt.f32 %v1911_v5 }
 0xfb3   : > { %2577 = vrsqrt.f32 %v1901_v3  ;;  %v1919_v52 = vpop.xlane.xlu0 %1918 }
 0xfb4   : > { %v1920_v6 = vmax.f32 %v1919_v52, 1e-24 }
 0xfb6   : > { %2579 = vrsqrt.f32 %v1920_v6 }
 0xfbc   : > { %v2576_v7 = vpop.eup %2575 }
 0xfbd   : > { %v2578_v46 = vpop.eup %2577  ;;  %v1913_v8 = vmul.f32 %v2576_v7, %v1892_v57 }
 0xfbe   : > { %v1903_v10 = vmul.f32 %v2578_v46, %v1892_v57 }
 0xfc0   : > { %v2580_v9 = vpop.eup %2579  ;;  %v1923_v12 = vsel %vm1100_vm5, %v1903_v10, %v1913_v8 }
 0xfc1   : > { %v1922_v11 = vmul.f32 %v2580_v9, %v1892_v57 }
 0xfc3   : > { %v1924_v13 = vsel %vm1689_vm12, %v1923_v12, %v1922_v11 }
 0xfc4   : > { %v1925_v27 = vsel %vm1853_vm14, %v1924_v13, 0.0 }
 0xfc5   : > { %1926 = vst [vmem:[%s3866_s5] sm:$0xf] %v1925_v27 }
 0xfc6 PF: > { %s3867_s30 = sld [smem:[#allocation28_spill]]  ;;  %s3868_s2 = sld [smem:[#allocation27_spill]] }
 0xfc7   : > { %s3869_s29 = sld [smem:[#allocation29_spill]]  ;;  %s3870_s27 = smov %s2957_s28 }
 0xfcc   : > { %p41_p6 = scmp.ge.s32.totalorder %s3867_s30, 4   ;;  %s3871_s28 = smov %s3868_s2 }
 0xfce   :  { %43 = sbr.rel (!%p41_p6) target bundleno = 25 (0x19), region = 250 }
 0xfd5   :  { %1938 = vsyncpa [#allocation4], 1 }
 0xfd6   :  { %1940 = vsyncpa [#allocation4 + $0x1], 1 }
 0xfd7   :  { %1941 = vsyncpa [#allocation6], 1 }
 0xfd8   :  { %1943 = vsyncpa [#allocation6 + $0x1], 1 }
 0xfd9   :  { %1944 = vsyncpa [#allocation9], 1 }
 0xfda   :  { %1946 = vsyncpa [#allocation9 + $0x1], 1 }
 0xfdb   :  { %1947 = vsyncpa [#allocation12], 1 }
 0xfdc   :  { %1949 = vsyncpa [#allocation12 + $0x1], 1 }
 0xfdd   :  { %1950 = vsyncpa [#allocation15], 1 }
 0xfde   :  { %1952 = vsyncpa [#allocation15 + $0x1], 1 }
 0xfdf   :  { %1953 = vsyncpa [#allocation18], 1 }
 0xfe0   :  { %1955 = vsyncpa [#allocation18 + $0x1], 1 }

</bundles_post_ra>
